<compile_context>
chip_gen: v7x
topology: tpu7x:2x2x1
jax: 0.10.0
libtpu: 0.0.40
codegen_flags: <defaults>
</compile_context>

<pallas_src>
import functools

import jax
import jax.numpy as jnp
from jax.experimental import pallas as pl
from jax.experimental.pallas import tpu as pltpu


def build_layer_config(feature_dim, level, layer_per_level, base_dim):
    """Replicates DaibinDecoder.__init__ bookkeeping.

    Returns a tuple of (c_in, c_out, upsample_before, relu_after) per Conv1d."""
    cfg = []
    last_dim = base_dim * 2 ** level
    for level_id in range(level + 1):
        dim = base_dim * 2 ** (level - level_id)
        for layer_id in range(layer_per_level):
            is_last = (level_id == level and layer_id == layer_per_level - 1)
            if is_last:
                dim = feature_dim
            upsample = (level_id > 0 and layer_id == 0)
            cfg.append((last_dim, dim, upsample, not is_last))
            last_dim = dim
    return tuple(cfg)


def daibin_decoder_kernel(x_ref, *refs, cfg, compute_dtype):
    """refs = (w_0, b_0, ..., w_{L-1}, b_{L-1}, o_ref).

    w_l: (c_in_l, 3*c_out_l) tap-packed conv weight [W0 | W1 | W2] (pre-transposed).
    b_l: (1, c_out_l).  The last layer's c_out is already padded to the
    lane-dense output width of o_ref (extra channels have zero weight/bias).
    """
    o_ref = refs[-1]
    w_refs = refs[:-1]

    h = x_ref[...].astype(jnp.float32)                       # (Bb, T, C0)

    for li, (_, c_out, upsample, relu) in enumerate(cfg):
        w = w_refs[2 * li][...]                               # (c_in, 3*c_out)
        b = w_refs[2 * li + 1][...]                           # (1, c_out)

        if upsample:
            # Nearest x2 upsample along time as a 0/1 selection matmul:
            # U[s, t] = 1 iff t == s // 2  (i.e. s - 2t in {0, 1}).
            Bb, T, C = h.shape
            row = jax.lax.broadcasted_iota(jnp.int32, (2 * T, T), 0)
            col = jax.lax.broadcasted_iota(jnp.int32, (2 * T, T), 1)
            d = row - 2 * col
            U = jnp.logical_or(d == 0, d == 1).astype(jnp.float32)
            ups = [jnp.dot(U, h[bb], preferred_element_type=jnp.float32)[None]
                   for bb in range(Bb)]
            h = ups[0] if Bb == 1 else jnp.concatenate(ups, axis=0)

        Bb, T, C = h.shape
        # One wide matmul for all three conv taps; batch folded into M.
        z = jnp.dot(h.reshape(Bb * T, C).astype(compute_dtype),
                    w.astype(compute_dtype),
                    preferred_element_type=jnp.float32)       # (Bb*T, 3*c_out)
        z = z.reshape(Bb, T, 3 * c_out)
        z0 = z[:, :, 0 * c_out:1 * c_out]                     # x[t-1] contribution
        z1 = z[:, :, 1 * c_out:2 * c_out]                     # x[t]   contribution
        z2 = z[:, :, 2 * c_out:3 * c_out]                     # x[t+1] contribution

        zero = jnp.zeros((Bb, 1, c_out), jnp.float32)
        y = (jnp.concatenate([zero, z0[:, :T - 1, :]], axis=1)   # shift down by 1
             + z1
             + jnp.concatenate([z2[:, 1:, :], zero], axis=1)     # shift up by 1
             + b.astype(jnp.float32))
        if relu:
            y = jnp.maximum(y, 0.0)
        h = y

    o_ref[...] = h.astype(o_ref.dtype)


def pack_conv_weight(w_torch, c_out_pad, dtype):
    """PyTorch Conv1d weight (c_out, c_in, 3) -> tap-packed (c_in, 3*c_out_pad)."""
    c_out = w_torch.shape[0]
    taps = []
    for k in range(3):
        t = jnp.transpose(w_torch[:, :, k])                   # (c_in, c_out)
        if c_out_pad > c_out:
            t = jnp.pad(t, ((0, 0), (0, c_out_pad - c_out)))
        taps.append(t)
    return jnp.concatenate(taps, axis=1).astype(dtype)


def daibin_decoder_forward(x, params, cfg, *, batch_block=1,
                           compute_dtype=jnp.float32):
    """x: (B, T, C_in) channels-last (same layout as the module's input `x`).
    params: list of (weight (c_out, c_in, 3), bias (c_out,)) per Conv1d
    in PyTorch convention."""
    B, T_in, c0 = x.shape
    assert c0 == cfg[0][0], (c0, cfg[0][0])
    assert B % batch_block == 0, (B, batch_block)
    assert len(params) == len(cfg)

    n_up = sum(1 for (_, _, up, _) in cfg if up)
    T_out = T_in * (2 ** n_up)
    feature_dim = cfg[-1][1]
    out_pad = ((feature_dim + 127) // 128) * 128              # lane-dense output

    # Kernel-side config: last layer computes the padded output width directly.
    kcfg = tuple((ci, out_pad if i == len(cfg) - 1 else co, up, relu)
                 for i, (ci, co, up, relu) in enumerate(cfg))

    flat = []
    for i, (w, b) in enumerate(params):
        co_eff = kcfg[i][1]
        flat.append(pack_conv_weight(w, co_eff, compute_dtype))
        bb = b if b.shape[0] == co_eff else jnp.pad(b, (0, co_eff - b.shape[0]))
        flat.append(bb.reshape(1, co_eff).astype(jnp.float32))

    in_specs = [pl.BlockSpec((batch_block, T_in, c0), lambda i: (i, 0, 0))]
    for arr in flat:
        in_specs.append(pl.BlockSpec(arr.shape, lambda i, nd=arr.ndim: (0,) * nd))

    kernel = functools.partial(daibin_decoder_kernel, cfg=kcfg,
                               compute_dtype=compute_dtype)

    out = pl.pallas_call(
        kernel,
        out_shape=jax.ShapeDtypeStruct((B, T_out, out_pad), jnp.float32),
        grid=(B // batch_block,),
        in_specs=in_specs,
        out_specs=pl.BlockSpec((batch_block, T_out, out_pad), lambda i: (i, 0, 0)),
        compiler_params=pltpu.CompilerParams(
            dimension_semantics=("parallel",),
        ),
    )(x, *flat)
    return out[:, :, :feature_dim]


def reference_forward(x, params, cfg):
    """Pure-JAX (XLA) reference matching the PyTorch module semantics."""
    h = x
    for (_, _, upsample, relu), (w, b) in zip(cfg, params):
        if upsample:
            h = jnp.repeat(h, 2, axis=1)
        hp = jnp.pad(h, ((0, 0), (1, 1), (0, 0)))
        y = (jnp.einsum('btc,dc->btd', hp[:, :-2, :], w[:, :, 0])
             + jnp.einsum('btc,dc->btd', hp[:, 1:-1, :], w[:, :, 1])
             + jnp.einsum('btc,dc->btd', hp[:, 2:, :], w[:, :, 2])
             + b)
        if relu:
            y = jnp.maximum(y, 0.0)
        h = y
    return h


def init_params(key, cfg):
    """Deterministic synthetic Conv1d parameters in PyTorch convention."""
    params = []
    for (c_in, c_out, _, _) in cfg:
        key, kw, kb = jax.random.split(key, 3)
        w = 0.1 * jax.random.normal(kw, (c_out, c_in, 3), dtype=jnp.float32)
        b = 0.1 * jax.random.normal(kb, (c_out,), dtype=jnp.float32)
        params.append((w, b))
    return params


if __name__ == "__main__":
    # Small config consistent with the module:
    #   feature_dim=4, level=2, layer_per_level=2, base_dim=8
    #   -> input channels = 8 * 2**2 = 32, T_out = T * 2**2.
    feature_dim, level, layer_per_level, base_dim = 4, 2, 2, 8
    B, T = 2, 8

    cfg = build_layer_config(feature_dim, level, layer_per_level, base_dim)
    c_in0 = cfg[0][0]

    key = jax.random.PRNGKey(0)
    k_x, k_p = jax.random.split(key)
    x = jax.random.normal(k_x, (B, T, c_in0), dtype=jnp.float32)
    params = init_params(k_p, cfg)

    out = daibin_decoder_forward(x, params, cfg, batch_block=1)
    out = jax.block_until_ready(out)

    T_out = T * 2 ** level
    assert out.shape == (B, T_out, feature_dim), out.shape
    assert bool(jnp.all(jnp.isfinite(out)))

    ref = reference_forward(x, params, cfg)
    max_err = float(jnp.max(jnp.abs(out - ref)))
    assert max_err < 5e-2, max_err

    print("KERNEL_OK")
</pallas_src>

<mosaic_0001>
module attributes {stable_mosaic.version = 11 : i64} {
  func.func @daibin_decoder_kernel(%arg0: i32, %arg1: memref<1x8x32xf32, #tpu.memory_space<vmem>>, %arg2: memref<32x96xf32, #tpu.memory_space<vmem>>, %arg3: memref<1x32xf32, #tpu.memory_space<vmem>>, %arg4: memref<32x96xf32, #tpu.memory_space<vmem>>, %arg5: memref<1x32xf32, #tpu.memory_space<vmem>>, %arg6: memref<32x48xf32, #tpu.memory_space<vmem>>, %arg7: memref<1x16xf32, #tpu.memory_space<vmem>>, %arg8: memref<16x48xf32, #tpu.memory_space<vmem>>, %arg9: memref<1x16xf32, #tpu.memory_space<vmem>>, %arg10: memref<16x24xf32, #tpu.memory_space<vmem>>, %arg11: memref<1x8xf32, #tpu.memory_space<vmem>>, %arg12: memref<8x384xf32, #tpu.memory_space<vmem>>, %arg13: memref<1x128xf32, #tpu.memory_space<vmem>>, %arg14: memref<1x32x128xf32, #tpu.memory_space<vmem>>) attributes {dimension_semantics = [#tpu.dimension_semantics<parallel>], iteration_bounds = array<i64: 2>, scalar_prefetch = 0 : i64, scratch_operands = 0 : i64, tpu.core_type = #tpu.core_type<tc>, window_params = [{transform_indices = @transform_0, window_bounds = array<i64: 1, 8, 32>}, {pipeline_mode = #tpu.pipeline_mode<synchronous>, transform_indices = @transform_1, window_bounds = array<i64: 32, 96>}, {pipeline_mode = #tpu.pipeline_mode<synchronous>, transform_indices = @transform_2, window_bounds = array<i64: 1, 32>}, {pipeline_mode = #tpu.pipeline_mode<synchronous>, transform_indices = @transform_3, window_bounds = array<i64: 32, 96>}, {pipeline_mode = #tpu.pipeline_mode<synchronous>, transform_indices = @transform_4, window_bounds = array<i64: 1, 32>}, {pipeline_mode = #tpu.pipeline_mode<synchronous>, transform_indices = @transform_5, window_bounds = array<i64: 32, 48>}, {pipeline_mode = #tpu.pipeline_mode<synchronous>, transform_indices = @transform_6, window_bounds = array<i64: 1, 16>}, {pipeline_mode = #tpu.pipeline_mode<synchronous>, transform_indices = @transform_7, window_bounds = array<i64: 16, 48>}, {pipeline_mode = #tpu.pipeline_mode<synchronous>, transform_indices = @transform_8, window_bounds = array<i64: 1, 16>}, {pipeline_mode = #tpu.pipeline_mode<synchronous>, transform_indices = @transform_9, window_bounds = array<i64: 16, 24>}, {pipeline_mode = #tpu.pipeline_mode<synchronous>, transform_indices = @transform_10, window_bounds = array<i64: 1, 8>}, {pipeline_mode = #tpu.pipeline_mode<synchronous>, transform_indices = @transform_11, window_bounds = array<i64: 8, 384>}, {pipeline_mode = #tpu.pipeline_mode<synchronous>, transform_indices = @transform_12, window_bounds = array<i64: 1, 128>}, {transform_indices = @transform_13, window_bounds = array<i64: 1, 32, 128>}]} {
    %c0 = arith.constant 0 : index
    %c0_0 = arith.constant 0 : index
    %c0_1 = arith.constant 0 : index
    %0 = vector.load %arg1[%c0, %c0_0, %c0_1] : memref<1x8x32xf32, #tpu.memory_space<vmem>>, vector<1x8x32xf32>
    %c0_2 = arith.constant 0 : index
    %c0_3 = arith.constant 0 : index
    %1 = vector.load %arg2[%c0_2, %c0_3] : memref<32x96xf32, #tpu.memory_space<vmem>>, vector<32x96xf32>
    %c0_4 = arith.constant 0 : index
    %c0_5 = arith.constant 0 : index
    %2 = vector.load %arg3[%c0_4, %c0_5] : memref<1x32xf32, #tpu.memory_space<vmem>>, vector<1x32xf32>
    %3 = vector.shape_cast %0 : vector<1x8x32xf32> to vector<8x32xf32>
    %cst = arith.constant dense<0.000000e+00> : vector<8x96xf32>
    %4 = tpu.matmul %3, %1, %cst {dimension_numbers = #tpu.dot_dimension_numbers<[1], [0], [0], [1], [0, 0, 1, 1], [], []>} : vector<8x32xf32>, vector<32x96xf32>, vector<8x96xf32> -> vector<8x96xf32>
    %5 = vector.shape_cast %4 : vector<8x96xf32> to vector<1x8x96xf32>
    %6 = vector.extract_strided_slice %5 {offsets = [0, 0, 0], sizes = [1, 8, 32], strides = [1, 1, 1]} : vector<1x8x96xf32> to vector<1x8x32xf32>
    %7 = vector.extract_strided_slice %5 {offsets = [0, 0, 32], sizes = [1, 8, 32], strides = [1, 1, 1]} : vector<1x8x96xf32> to vector<1x8x32xf32>
    %8 = vector.extract_strided_slice %5 {offsets = [0, 0, 64], sizes = [1, 8, 32], strides = [1, 1, 1]} : vector<1x8x96xf32> to vector<1x8x32xf32>
    %cst_6 = arith.constant 0.000000e+00 : f32
    %9 = vector.broadcast %cst_6 : f32 to vector<1x1x32xf32>
    %10 = vector.extract_strided_slice %6 {offsets = [0, 0, 0], sizes = [1, 7, 32], strides = [1, 1, 1]} : vector<1x8x32xf32> to vector<1x7x32xf32>
    %11 = tpu.concatenate %9, %10 in 1 : vector<1x1x32xf32>, vector<1x7x32xf32> -> vector<1x8x32xf32>
    %12 = arith.addf %11, %7 : vector<1x8x32xf32>
    %13 = vector.extract_strided_slice %8 {offsets = [0, 1, 0], sizes = [1, 7, 32], strides = [1, 1, 1]} : vector<1x8x32xf32> to vector<1x7x32xf32>
    %14 = tpu.concatenate %13, %9 in 1 : vector<1x7x32xf32>, vector<1x1x32xf32> -> vector<1x8x32xf32>
    %15 = arith.addf %12, %14 : vector<1x8x32xf32>
    %16 = vector.shape_cast %2 : vector<1x32xf32> to vector<1x1x32xf32>
    %17 = vector.broadcast %16 : vector<1x1x32xf32> to vector<1x8x32xf32>
    %18 = arith.addf %15, %17 : vector<1x8x32xf32>
    %cst_7 = arith.constant 0.000000e+00 : f32
    %19 = vector.broadcast %cst_7 : f32 to vector<1x8x32xf32>
    %20 = arith.maximumf %18, %19 : vector<1x8x32xf32>
    %c0_8 = arith.constant 0 : index
    %c0_9 = arith.constant 0 : index
    %21 = vector.load %arg4[%c0_8, %c0_9] : memref<32x96xf32, #tpu.memory_space<vmem>>, vector<32x96xf32>
    %c0_10 = arith.constant 0 : index
    %c0_11 = arith.constant 0 : index
    %22 = vector.load %arg5[%c0_10, %c0_11] : memref<1x32xf32, #tpu.memory_space<vmem>>, vector<1x32xf32>
    %23 = vector.shape_cast %20 : vector<1x8x32xf32> to vector<8x32xf32>
    %cst_12 = arith.constant dense<0.000000e+00> : vector<8x96xf32>
    %24 = tpu.matmul %23, %21, %cst_12 {dimension_numbers = #tpu.dot_dimension_numbers<[1], [0], [0], [1], [0, 0, 1, 1], [], []>} : vector<8x32xf32>, vector<32x96xf32>, vector<8x96xf32> -> vector<8x96xf32>
    %25 = vector.shape_cast %24 : vector<8x96xf32> to vector<1x8x96xf32>
    %26 = vector.extract_strided_slice %25 {offsets = [0, 0, 0], sizes = [1, 8, 32], strides = [1, 1, 1]} : vector<1x8x96xf32> to vector<1x8x32xf32>
    %27 = vector.extract_strided_slice %25 {offsets = [0, 0, 32], sizes = [1, 8, 32], strides = [1, 1, 1]} : vector<1x8x96xf32> to vector<1x8x32xf32>
    %28 = vector.extract_strided_slice %25 {offsets = [0, 0, 64], sizes = [1, 8, 32], strides = [1, 1, 1]} : vector<1x8x96xf32> to vector<1x8x32xf32>
    %cst_13 = arith.constant 0.000000e+00 : f32
    %29 = vector.broadcast %cst_13 : f32 to vector<1x1x32xf32>
    %30 = vector.extract_strided_slice %26 {offsets = [0, 0, 0], sizes = [1, 7, 32], strides = [1, 1, 1]} : vector<1x8x32xf32> to vector<1x7x32xf32>
    %31 = tpu.concatenate %29, %30 in 1 : vector<1x1x32xf32>, vector<1x7x32xf32> -> vector<1x8x32xf32>
    %32 = arith.addf %31, %27 : vector<1x8x32xf32>
    %33 = vector.extract_strided_slice %28 {offsets = [0, 1, 0], sizes = [1, 7, 32], strides = [1, 1, 1]} : vector<1x8x32xf32> to vector<1x7x32xf32>
    %34 = tpu.concatenate %33, %29 in 1 : vector<1x7x32xf32>, vector<1x1x32xf32> -> vector<1x8x32xf32>
    %35 = arith.addf %32, %34 : vector<1x8x32xf32>
    %36 = vector.shape_cast %22 : vector<1x32xf32> to vector<1x1x32xf32>
    %37 = vector.broadcast %36 : vector<1x1x32xf32> to vector<1x8x32xf32>
    %38 = arith.addf %35, %37 : vector<1x8x32xf32>
    %cst_14 = arith.constant 0.000000e+00 : f32
    %39 = vector.broadcast %cst_14 : f32 to vector<1x8x32xf32>
    %40 = arith.maximumf %38, %39 : vector<1x8x32xf32>
    %c0_15 = arith.constant 0 : index
    %c0_16 = arith.constant 0 : index
    %41 = vector.load %arg6[%c0_15, %c0_16] : memref<32x48xf32, #tpu.memory_space<vmem>>, vector<32x48xf32>
    %c0_17 = arith.constant 0 : index
    %c0_18 = arith.constant 0 : index
    %42 = vector.load %arg7[%c0_17, %c0_18] : memref<1x16xf32, #tpu.memory_space<vmem>>, vector<1x16xf32>
    %43 = tpu.iota {dimensions = array<i32: 0>} : vector<16x8xi32>
    %44 = tpu.iota {dimensions = array<i32: 1>} : vector<16x8xi32>
    %c2_i32 = arith.constant 2 : i32
    %45 = vector.broadcast %c2_i32 : i32 to vector<16x8xi32>
    %46 = arith.muli %45, %44 : vector<16x8xi32>
    %47 = arith.subi %43, %46 : vector<16x8xi32>
    %c0_i32 = arith.constant 0 : i32
    %48 = vector.broadcast %c0_i32 : i32 to vector<16x8xi32>
    %49 = arith.cmpi eq, %47, %48 : vector<16x8xi32>
    %c1_i32 = arith.constant 1 : i32
    %50 = vector.broadcast %c1_i32 : i32 to vector<16x8xi32>
    %51 = arith.cmpi eq, %47, %50 : vector<16x8xi32>
    %52 = arith.ori %49, %51 : vector<16x8xi1>
    %53 = arith.extui %52 : vector<16x8xi1> to vector<16x8xi32>
    %54 = arith.sitofp %53 : vector<16x8xi32> to vector<16x8xf32>
    %55 = vector.shape_cast %40 : vector<1x8x32xf32> to vector<8x32xf32>
    %cst_19 = arith.constant dense<0.000000e+00> : vector<16x32xf32>
    %56 = tpu.matmul %54, %55, %cst_19 {dimension_numbers = #tpu.dot_dimension_numbers<[1], [0], [0], [1], [0, 0, 1, 1], [], []>} : vector<16x8xf32>, vector<8x32xf32>, vector<16x32xf32> -> vector<16x32xf32>
    %57 = vector.shape_cast %56 : vector<16x32xf32> to vector<1x16x32xf32>
    %58 = vector.shape_cast %57 : vector<1x16x32xf32> to vector<16x32xf32>
    %cst_20 = arith.constant dense<0.000000e+00> : vector<16x48xf32>
    %59 = tpu.matmul %58, %41, %cst_20 {dimension_numbers = #tpu.dot_dimension_numbers<[1], [0], [0], [1], [0, 0, 1, 1], [], []>} : vector<16x32xf32>, vector<32x48xf32>, vector<16x48xf32> -> vector<16x48xf32>
    %60 = vector.shape_cast %59 : vector<16x48xf32> to vector<1x16x48xf32>
    %61 = vector.extract_strided_slice %60 {offsets = [0, 0, 0], sizes = [1, 16, 16], strides = [1, 1, 1]} : vector<1x16x48xf32> to vector<1x16x16xf32>
    %62 = vector.extract_strided_slice %60 {offsets = [0, 0, 16], sizes = [1, 16, 16], strides = [1, 1, 1]} : vector<1x16x48xf32> to vector<1x16x16xf32>
    %63 = vector.extract_strided_slice %60 {offsets = [0, 0, 32], sizes = [1, 16, 16], strides = [1, 1, 1]} : vector<1x16x48xf32> to vector<1x16x16xf32>
    %cst_21 = arith.constant 0.000000e+00 : f32
    %64 = vector.broadcast %cst_21 : f32 to vector<1x1x16xf32>
    %65 = vector.extract_strided_slice %61 {offsets = [0, 0, 0], sizes = [1, 15, 16], strides = [1, 1, 1]} : vector<1x16x16xf32> to vector<1x15x16xf32>
    %66 = tpu.concatenate %64, %65 in 1 : vector<1x1x16xf32>, vector<1x15x16xf32> -> vector<1x16x16xf32>
    %67 = arith.addf %66, %62 : vector<1x16x16xf32>
    %68 = vector.extract_strided_slice %63 {offsets = [0, 1, 0], sizes = [1, 15, 16], strides = [1, 1, 1]} : vector<1x16x16xf32> to vector<1x15x16xf32>
    %69 = tpu.concatenate %68, %64 in 1 : vector<1x15x16xf32>, vector<1x1x16xf32> -> vector<1x16x16xf32>
    %70 = arith.addf %67, %69 : vector<1x16x16xf32>
    %71 = vector.shape_cast %42 : vector<1x16xf32> to vector<1x1x16xf32>
    %72 = vector.broadcast %71 : vector<1x1x16xf32> to vector<1x16x16xf32>
    %73 = arith.addf %70, %72 : vector<1x16x16xf32>
    %cst_22 = arith.constant 0.000000e+00 : f32
    %74 = vector.broadcast %cst_22 : f32 to vector<1x16x16xf32>
    %75 = arith.maximumf %73, %74 : vector<1x16x16xf32>
    %c0_23 = arith.constant 0 : index
    %c0_24 = arith.constant 0 : index
    %76 = vector.load %arg8[%c0_23, %c0_24] : memref<16x48xf32, #tpu.memory_space<vmem>>, vector<16x48xf32>
    %c0_25 = arith.constant 0 : index
    %c0_26 = arith.constant 0 : index
    %77 = vector.load %arg9[%c0_25, %c0_26] : memref<1x16xf32, #tpu.memory_space<vmem>>, vector<1x16xf32>
    %78 = vector.shape_cast %75 : vector<1x16x16xf32> to vector<16x16xf32>
    %cst_27 = arith.constant dense<0.000000e+00> : vector<16x48xf32>
    %79 = tpu.matmul %78, %76, %cst_27 {dimension_numbers = #tpu.dot_dimension_numbers<[1], [0], [0], [1], [0, 0, 1, 1], [], []>} : vector<16x16xf32>, vector<16x48xf32>, vector<16x48xf32> -> vector<16x48xf32>
    %80 = vector.shape_cast %79 : vector<16x48xf32> to vector<1x16x48xf32>
    %81 = vector.extract_strided_slice %80 {offsets = [0, 0, 0], sizes = [1, 16, 16], strides = [1, 1, 1]} : vector<1x16x48xf32> to vector<1x16x16xf32>
    %82 = vector.extract_strided_slice %80 {offsets = [0, 0, 16], sizes = [1, 16, 16], strides = [1, 1, 1]} : vector<1x16x48xf32> to vector<1x16x16xf32>
    %83 = vector.extract_strided_slice %80 {offsets = [0, 0, 32], sizes = [1, 16, 16], strides = [1, 1, 1]} : vector<1x16x48xf32> to vector<1x16x16xf32>
    %cst_28 = arith.constant 0.000000e+00 : f32
    %84 = vector.broadcast %cst_28 : f32 to vector<1x1x16xf32>
    %85 = vector.extract_strided_slice %81 {offsets = [0, 0, 0], sizes = [1, 15, 16], strides = [1, 1, 1]} : vector<1x16x16xf32> to vector<1x15x16xf32>
    %86 = tpu.concatenate %84, %85 in 1 : vector<1x1x16xf32>, vector<1x15x16xf32> -> vector<1x16x16xf32>
    %87 = arith.addf %86, %82 : vector<1x16x16xf32>
    %88 = vector.extract_strided_slice %83 {offsets = [0, 1, 0], sizes = [1, 15, 16], strides = [1, 1, 1]} : vector<1x16x16xf32> to vector<1x15x16xf32>
    %89 = tpu.concatenate %88, %84 in 1 : vector<1x15x16xf32>, vector<1x1x16xf32> -> vector<1x16x16xf32>
    %90 = arith.addf %87, %89 : vector<1x16x16xf32>
    %91 = vector.shape_cast %77 : vector<1x16xf32> to vector<1x1x16xf32>
    %92 = vector.broadcast %91 : vector<1x1x16xf32> to vector<1x16x16xf32>
    %93 = arith.addf %90, %92 : vector<1x16x16xf32>
    %cst_29 = arith.constant 0.000000e+00 : f32
    %94 = vector.broadcast %cst_29 : f32 to vector<1x16x16xf32>
    %95 = arith.maximumf %93, %94 : vector<1x16x16xf32>
    %c0_30 = arith.constant 0 : index
    %c0_31 = arith.constant 0 : index
    %96 = vector.load %arg10[%c0_30, %c0_31] : memref<16x24xf32, #tpu.memory_space<vmem>>, vector<16x24xf32>
    %c0_32 = arith.constant 0 : index
    %c0_33 = arith.constant 0 : index
    %97 = vector.load %arg11[%c0_32, %c0_33] : memref<1x8xf32, #tpu.memory_space<vmem>>, vector<1x8xf32>
    %98 = tpu.iota {dimensions = array<i32: 0>} : vector<32x16xi32>
    %99 = tpu.iota {dimensions = array<i32: 1>} : vector<32x16xi32>
    %c2_i32_34 = arith.constant 2 : i32
    %100 = vector.broadcast %c2_i32_34 : i32 to vector<32x16xi32>
    %101 = arith.muli %100, %99 : vector<32x16xi32>
    %102 = arith.subi %98, %101 : vector<32x16xi32>
    %c0_i32_35 = arith.constant 0 : i32
    %103 = vector.broadcast %c0_i32_35 : i32 to vector<32x16xi32>
    %104 = arith.cmpi eq, %102, %103 : vector<32x16xi32>
    %c1_i32_36 = arith.constant 1 : i32
    %105 = vector.broadcast %c1_i32_36 : i32 to vector<32x16xi32>
    %106 = arith.cmpi eq, %102, %105 : vector<32x16xi32>
    %107 = arith.ori %104, %106 : vector<32x16xi1>
    %108 = arith.extui %107 : vector<32x16xi1> to vector<32x16xi32>
    %109 = arith.sitofp %108 : vector<32x16xi32> to vector<32x16xf32>
    %110 = vector.shape_cast %95 : vector<1x16x16xf32> to vector<16x16xf32>
    %cst_37 = arith.constant dense<0.000000e+00> : vector<32x16xf32>
    %111 = tpu.matmul %109, %110, %cst_37 {dimension_numbers = #tpu.dot_dimension_numbers<[1], [0], [0], [1], [0, 0, 1, 1], [], []>} : vector<32x16xf32>, vector<16x16xf32>, vector<32x16xf32> -> vector<32x16xf32>
    %112 = vector.shape_cast %111 : vector<32x16xf32> to vector<1x32x16xf32>
    %113 = vector.shape_cast %112 : vector<1x32x16xf32> to vector<32x16xf32>
    %cst_38 = arith.constant dense<0.000000e+00> : vector<32x24xf32>
    %114 = tpu.matmul %113, %96, %cst_38 {dimension_numbers = #tpu.dot_dimension_numbers<[1], [0], [0], [1], [0, 0, 1, 1], [], []>} : vector<32x16xf32>, vector<16x24xf32>, vector<32x24xf32> -> vector<32x24xf32>
    %115 = vector.shape_cast %114 : vector<32x24xf32> to vector<1x32x24xf32>
    %116 = vector.extract_strided_slice %115 {offsets = [0, 0, 0], sizes = [1, 32, 8], strides = [1, 1, 1]} : vector<1x32x24xf32> to vector<1x32x8xf32>
    %117 = vector.extract_strided_slice %115 {offsets = [0, 0, 8], sizes = [1, 32, 8], strides = [1, 1, 1]} : vector<1x32x24xf32> to vector<1x32x8xf32>
    %118 = vector.extract_strided_slice %115 {offsets = [0, 0, 16], sizes = [1, 32, 8], strides = [1, 1, 1]} : vector<1x32x24xf32> to vector<1x32x8xf32>
    %cst_39 = arith.constant 0.000000e+00 : f32
    %119 = vector.broadcast %cst_39 : f32 to vector<1x1x8xf32>
    %120 = vector.extract_strided_slice %116 {offsets = [0, 0, 0], sizes = [1, 31, 8], strides = [1, 1, 1]} : vector<1x32x8xf32> to vector<1x31x8xf32>
    %121 = tpu.concatenate %119, %120 in 1 : vector<1x1x8xf32>, vector<1x31x8xf32> -> vector<1x32x8xf32>
    %122 = arith.addf %121, %117 : vector<1x32x8xf32>
    %123 = vector.extract_strided_slice %118 {offsets = [0, 1, 0], sizes = [1, 31, 8], strides = [1, 1, 1]} : vector<1x32x8xf32> to vector<1x31x8xf32>
    %124 = tpu.concatenate %123, %119 in 1 : vector<1x31x8xf32>, vector<1x1x8xf32> -> vector<1x32x8xf32>
    %125 = arith.addf %122, %124 : vector<1x32x8xf32>
    %126 = vector.shape_cast %97 : vector<1x8xf32> to vector<1x1x8xf32>
    %127 = vector.broadcast %126 : vector<1x1x8xf32> to vector<1x32x8xf32>
    %128 = arith.addf %125, %127 : vector<1x32x8xf32>
    %cst_40 = arith.constant 0.000000e+00 : f32
    %129 = vector.broadcast %cst_40 : f32 to vector<1x32x8xf32>
    %130 = arith.maximumf %128, %129 : vector<1x32x8xf32>
    %c0_41 = arith.constant 0 : index
    %c0_42 = arith.constant 0 : index
    %131 = vector.load %arg12[%c0_41, %c0_42] : memref<8x384xf32, #tpu.memory_space<vmem>>, vector<8x384xf32>
    %c0_43 = arith.constant 0 : index
    %c0_44 = arith.constant 0 : index
    %132 = vector.load %arg13[%c0_43, %c0_44] : memref<1x128xf32, #tpu.memory_space<vmem>>, vector<1x128xf32>
    %133 = vector.shape_cast %130 : vector<1x32x8xf32> to vector<32x8xf32>
    %cst_45 = arith.constant dense<0.000000e+00> : vector<32x384xf32>
    %134 = tpu.matmul %133, %131, %cst_45 {dimension_numbers = #tpu.dot_dimension_numbers<[1], [0], [0], [1], [0, 0, 1, 1], [], []>} : vector<32x8xf32>, vector<8x384xf32>, vector<32x384xf32> -> vector<32x384xf32>
    %135 = vector.shape_cast %134 : vector<32x384xf32> to vector<1x32x384xf32>
    %136 = vector.extract_strided_slice %135 {offsets = [0, 0, 0], sizes = [1, 32, 128], strides = [1, 1, 1]} : vector<1x32x384xf32> to vector<1x32x128xf32>
    %137 = vector.extract_strided_slice %135 {offsets = [0, 0, 128], sizes = [1, 32, 128], strides = [1, 1, 1]} : vector<1x32x384xf32> to vector<1x32x128xf32>
    %138 = vector.extract_strided_slice %135 {offsets = [0, 0, 256], sizes = [1, 32, 128], strides = [1, 1, 1]} : vector<1x32x384xf32> to vector<1x32x128xf32>
    %cst_46 = arith.constant 0.000000e+00 : f32
    %139 = vector.broadcast %cst_46 : f32 to vector<1x1x128xf32>
    %140 = vector.extract_strided_slice %136 {offsets = [0, 0, 0], sizes = [1, 31, 128], strides = [1, 1, 1]} : vector<1x32x128xf32> to vector<1x31x128xf32>
    %141 = tpu.concatenate %139, %140 in 1 : vector<1x1x128xf32>, vector<1x31x128xf32> -> vector<1x32x128xf32>
    %142 = arith.addf %141, %137 : vector<1x32x128xf32>
    %143 = vector.extract_strided_slice %138 {offsets = [0, 1, 0], sizes = [1, 31, 128], strides = [1, 1, 1]} : vector<1x32x128xf32> to vector<1x31x128xf32>
    %144 = tpu.concatenate %143, %139 in 1 : vector<1x31x128xf32>, vector<1x1x128xf32> -> vector<1x32x128xf32>
    %145 = arith.addf %142, %144 : vector<1x32x128xf32>
    %146 = vector.shape_cast %132 : vector<1x128xf32> to vector<1x1x128xf32>
    %147 = vector.broadcast %146 : vector<1x1x128xf32> to vector<1x32x128xf32>
    %148 = arith.addf %145, %147 : vector<1x32x128xf32>
    %c0_47 = arith.constant 0 : index
    %c0_48 = arith.constant 0 : index
    %c0_49 = arith.constant 0 : index
    %149 = vector.load %arg14[%c0_47, %c0_48, %c0_49] : memref<1x32x128xf32, #tpu.memory_space<vmem>>, vector<1x32x128xf32>
    tpu.vector_store %arg14[%c0_47, %c0_48, %c0_49], %148 {strides = array<i32>} : memref<1x32x128xf32, #tpu.memory_space<vmem>>, vector<1x32x128xf32>,
    return
  }
  func.func @transform_0(%arg0: i32) -> (i32, i32, i32) {
    %c0_i32 = arith.constant 0 : i32
    %c0_i32_0 = arith.constant 0 : i32
    %c0_i32_1 = arith.constant 0 : i32
    return %arg0, %c0_i32, %c0_i32_0 : i32, i32, i32
  }
  func.func @transform_1(%arg0: i32) -> (i32, i32) {
    %c0_i32 = arith.constant 0 : i32
    %c0_i32_0 = arith.constant 0 : i32
    %c0_i32_1 = arith.constant 0 : i32
    return %c0_i32, %c0_i32_0 : i32, i32
  }
  func.func @transform_2(%arg0: i32) -> (i32, i32) {
    %c0_i32 = arith.constant 0 : i32
    %c0_i32_0 = arith.constant 0 : i32
    %c0_i32_1 = arith.constant 0 : i32
    return %c0_i32, %c0_i32_0 : i32, i32
  }
  func.func @transform_3(%arg0: i32) -> (i32, i32) {
    %c0_i32 = arith.constant 0 : i32
    %c0_i32_0 = arith.constant 0 : i32
    %c0_i32_1 = arith.constant 0 : i32
    return %c0_i32, %c0_i32_0 : i32, i32
  }
  func.func @transform_4(%arg0: i32) -> (i32, i32) {
    %c0_i32 = arith.constant 0 : i32
    %c0_i32_0 = arith.constant 0 : i32
    %c0_i32_1 = arith.constant 0 : i32
    return %c0_i32, %c0_i32_0 : i32, i32
  }
  func.func @transform_5(%arg0: i32) -> (i32, i32) {
    %c0_i32 = arith.constant 0 : i32
    %c0_i32_0 = arith.constant 0 : i32
    %c0_i32_1 = arith.constant 0 : i32
    return %c0_i32, %c0_i32_0 : i32, i32
  }
  func.func @transform_6(%arg0: i32) -> (i32, i32) {
    %c0_i32 = arith.constant 0 : i32
    %c0_i32_0 = arith.constant 0 : i32
    %c0_i32_1 = arith.constant 0 : i32
    return %c0_i32, %c0_i32_0 : i32, i32
  }
  func.func @transform_7(%arg0: i32) -> (i32, i32) {
    %c0_i32 = arith.constant 0 : i32
    %c0_i32_0 = arith.constant 0 : i32
    %c0_i32_1 = arith.constant 0 : i32
    return %c0_i32, %c0_i32_0 : i32, i32
  }
  func.func @transform_8(%arg0: i32) -> (i32, i32) {
    %c0_i32 = arith.constant 0 : i32
    %c0_i32_0 = arith.constant 0 : i32
    %c0_i32_1 = arith.constant 0 : i32
    return %c0_i32, %c0_i32_0 : i32, i32
  }
  func.func @transform_9(%arg0: i32) -> (i32, i32) {
    %c0_i32 = arith.constant 0 : i32
    %c0_i32_0 = arith.constant 0 : i32
    %c0_i32_1 = arith.constant 0 : i32
    return %c0_i32, %c0_i32_0 : i32, i32
  }
  func.func @transform_10(%arg0: i32) -> (i32, i32) {
    %c0_i32 = arith.constant 0 : i32
    %c0_i32_0 = arith.constant 0 : i32
    %c0_i32_1 = arith.constant 0 : i32
    return %c0_i32, %c0_i32_0 : i32, i32
  }
  func.func @transform_11(%arg0: i32) -> (i32, i32) {
    %c0_i32 = arith.constant 0 : i32
    %c0_i32_0 = arith.constant 0 : i32
    %c0_i32_1 = arith.constant 0 : i32
    return %c0_i32, %c0_i32_0 : i32, i32
  }
  func.func @transform_12(%arg0: i32) -> (i32, i32) {
    %c0_i32 = arith.constant 0 : i32
    %c0_i32_0 = arith.constant 0 : i32
    %c0_i32_1 = arith.constant 0 : i32
    return %c0_i32, %c0_i32_0 : i32, i32
  }
  func.func @transform_13(%arg0: i32) -> (i32, i32, i32) {
    %c0_i32 = arith.constant 0 : i32
    %c0_i32_0 = arith.constant 0 : i32
    %c0_i32_1 = arith.constant 0 : i32
    return %arg0, %c0_i32, %c0_i32_0 : i32, i32, i32
  }
}

</mosaic_0001>

<bundles_post_ra>
// kernel: tpu_custom_call.1
= control target key start
LH: loop header
LB: loop body
LE: loop exit
PB: predicated region body
PF: predicated region fallthrough
CT: control target
= control target key end

     0   :  { %s3081_s0 = inlined_call_operand.hbm [shape: f32[2,8,32], index: 0, kind: input, shape index: {}]   ;;  %s3082_s1 = inlined_call_operand.hbm [shape: f32[32,96], index: 1, kind: input, shape index: {}]   ;;  %s3083_s2 = inlined_call_operand.vmem [shape: f32[1,32], index: 2, kind: input, shape index: {}]   ;;  %s3084_s3 = inlined_call_operand.hbm [shape: f32[32,96], index: 3, kind: input, shape index: {}]   ;;  %s3085_s4 = inlined_call_operand.hbm [shape: f32[1,32], index: 4, kind: input, shape index: {}]   ;;  %s3086_s5 = inlined_call_operand.hbm [shape: f32[32,48], index: 5, kind: input, shape index: {}]   ;;  %s3087_s6 = inlined_call_operand.hbm [shape: f32[1,16], index: 6, kind: input, shape index: {}]   ;;  %s3088_s7 = inlined_call_operand.vmem [shape: f32[16,48], index: 7, kind: input, shape index: {}]   ;;  %s3089_s8 = inlined_call_operand.hbm [shape: f32[1,16], index: 8, kind: input, shape index: {}]   ;;  %s3090_s9 = inlined_call_operand.hbm [shape: f32[16,24], index: 9, kind: input, shape index: {}]   ;;  %s3091_s10 = inlined_call_operand.hbm [shape: f32[1,8], index: 10, kind: input, shape index: {}]   ;;  %s3092_s11 = inlined_call_operand.vmem [shape: f32[8,384], index: 11, kind: input, shape index: {}]   ;;  %s3093_s12 = inlined_call_operand.vmem [shape: f32[1,128], index: 12, kind: input, shape index: {}]   ;;  %s3094_s13 = inlined_call_operand.hbm [shape: f32[2,32,128], index: 13, kind: output, shape index: {}]  }
   0x1   :  { %3103 = sst [smem:[#allocation24_spill]] %s3082_s1 }
   0x2   :  { %3104 = sst [smem:[#allocation25_spill]] %s3083_s2 }
   0x3   :  { %3105 = sst [smem:[#allocation26_spill]] %s3088_s7 }
   0x4   :  { %3106 = sst [smem:[#allocation27_spill]] %s3092_s11 }
   0x5   :  { %3107 = sst [smem:[#allocation28_spill]] %s3093_s12 }
   0x6   :  { %3108 = sst [smem:[#allocation29_spill]] %s3094_s13 }
   0x7   :  { %18 = vsyncpa [#allocation3], 0 }
   0x8   :  { %20 = vsyncpa [#allocation3 + $0x1], 0 }
   0x9   :  { %21 = vsyncpa [#allocation6], 0 }
   0xa   :  { %22 = vsyncpa [#allocation9], 0 }
   0xb   :  { %23 = vsyncpa [#allocation12], 0 }
   0xc   :  { %24 = vsyncpa [#allocation15], 0 }
   0xd   :  { %25 = vsyncpa [#allocation4], 0 }
   0xe   :  { %27 = vsyncpa [#allocation4 + $0x1], 0  ;;  %s2587_s25 = smov 0   ;;  %s2589_s26 = smov 0  }
   0xf   :  { %s2591_s27 = smov 0   ;;  %s2593_s28 = smov 0  }
  0x10 LB: > { %s2496_s29 = smov [#allocation5]   ;;  %s2608_s14 = sadd.s32 4294967295, %s2494_s28   ;;  %s2494_s28 = sphi %s2593_s28, %s3140_s28   ;;  %s2490_s27 = sphi %s2591_s27, %s3139_s27   ;;  %s2486_s26 = sphi %s2589_s26, %s3138_s26   ;;  %s2482_s25 = sphi %s2587_s25, %s3137_s25  }
  0x11   : > { %s354_s30 = sshll.u32 %s2496_s29, 4  ;;  %p1812_p0 = scmp.ge.s32.totalorder %s2494_s28, 1  ;;  %s2613_s30 = int_to_ptr.vmem [resolvable:$true] %s354_s30 }
  0x12   : > { %p3100_p1 = scmp.eq.s32.totalorder %s2608_s14, 0  ;;  %p342_p2 = scmp.lt.s32.totalorder %s2494_s28, 3 }
  0x13   : > { %s2497_s16 = smov [#allocation8]   ;;  %s2498_s19 = smov [#allocation11]  }
  0x14   : > { %p2615_p3 = pnand %p1812_p0, %p342_p2  ;;  %s384_s17 = sshll.u32 %s2497_s16, 4  ;;  %s2628_s17 = int_to_ptr.vmem [resolvable:$true] %s384_s17 }
  0x15   : > { %s408_s20 = sshll.u32 %s2498_s19, 4  ;;  %s3111_s1 = sld [smem:[#allocation24_spill]]  ;;  %s2630_s20 = int_to_ptr.vmem [resolvable:$true] %s408_s20 }
  0x16   : > { %s3109_s15 = scalar_select %p2615_p3, 1, 0 }
  0x17   : > { %p2056_p5 = pneg %p2615_p3 }
  0x19   : > { %p2624_p6 = pnand %p2056_p5, %p3100_p1 }
  0x1b   : > { %s2158_s23 = scalar_lea.hbm %s3111_s1, 512  ;;  %p2640_p8 = pneg %p2624_p6 }
  0x1c   : > { %p2159_p7 = scmp.ne.s32.totalorder %s3111_s1, %s2158_s23  ;;  %p2165_p11 = scmp.lt.u32.totalorder %s2158_s23, %s3111_s1 }
  0x1e   : > { %p2161_p9 = pnand %p2640_p8, %p2159_p7 }
  0x20   : > { %p2162_p10 = pneg %p2161_p9 }
  0x22   : > { %p2167_p12 = pnand %p2165_p11, %p2162_p10 }
  0x24   : > { %2170 = shalt.err (!%p2167_p12)
}
  0x25   : > { %s2171_s21 = scalar_lea.vmem %s2613_s30, 512  ;;  %p2179_p5 = scmp.lt.s32.totalorder %s2613_s30, %s2613_s30 }
  0x26   : > { %p2172_p13 = scmp.ne.s32.totalorder %s2613_s30, %s2171_s21  ;;  %p2180_p4 = scmp.lt.s32.totalorder %s2171_s21, %s2171_s21 }
  0x28   : > { %p2174_p0 = pnand %p2172_p13, %p2640_p8  ;;  %p2181_p7 = por %p2180_p4, %p2179_p5 }
  0x2a   : > { %p2175_p2 = pneg %p2174_p0 }
  0x2c   : > { %p2182_p9 = pnand %p2181_p7, %p2175_p2 }
  0x2e   : > { %2185 = shalt.err (!%p2182_p9)
}
  0x2f   : > { %s3098_s22 = smov 128   ;;  %s2500_s13 = smov 8  }
  0x30   : > { %2059 = dma.hbm_to_vmem [thread:$0]  (!%p2624_p6), %s3111_s1, 512, %s2613_s30, [#allocation6], %s3098_s22, %s3098_s22, %s2500_s13  }
  0x31   : > { %s2186_s21 = scalar_lea.hbm %s3085_s4, 16 }
  0x32   : > { %p2187_p4 = scmp.ne.s32.totalorder %s3085_s4, %s2186_s21  ;;  %p2193_p12 = scmp.lt.u32.totalorder %s2186_s21, %s3085_s4 }
  0x34   : > { %p2189_p10 = pnand %p2187_p4, %p2640_p8 }
  0x36   : > { %p2190_p11 = pneg %p2189_p10 }
  0x38   : > { %p2195_p13 = pnand %p2193_p12, %p2190_p11 }
  0x3a   : > { %2198 = shalt.err (!%p2195_p13)
}
  0x3b   : > { %s2199_s30 = scalar_lea.vmem %s2628_s17, 16  ;;  %s2206_s11 = scalar_lea.vmem %s2628_s17, 32 }
  0x3c   : > { %p2200_p0 = scmp.ne.s32.totalorder %s2628_s17, %s2199_s30  ;;  %p2207_p7 = scmp.lt.s32.totalorder %s2628_s17, %s2628_s17 }
  0x3d   : > { %p2208_p9 = scmp.lt.s32.totalorder %s2206_s11, %s2199_s30 }
  0x3e   : > { %p2202_p2 = pnand %p2200_p0, %p2640_p8 }
  0x3f   : > { %p2209_p4 = por %p2208_p9, %p2207_p7 }
  0x40   : > { %p2203_p5 = pneg %p2202_p2 }
  0x42   : > { %p2210_p10 = pnand %p2209_p4, %p2203_p5 }
  0x44   : > { %2213 = shalt.err (!%p2210_p10)
}
  0x45   : > { %2065 = dma.hbm_to_vmem [thread:$0]  (!%p2624_p6), %s3085_s4, 16, %s2628_s17, [#allocation9]  }
  0x46   : > { %s2214_s24 = scalar_lea.hbm %s3087_s6, 16 }
  0x47   : > { %p2215_p11 = scmp.ne.s32.totalorder %s3087_s6, %s2214_s24  ;;  %p2221_p0 = scmp.lt.u32.totalorder %s2214_s24, %s3087_s6 }
  0x49   : > { %p2217_p12 = pnand %p2215_p11, %p2640_p8 }
  0x4b   : > { %p2218_p13 = pneg %p2217_p12 }
  0x4d   : > { %p2223_p2 = pnand %p2221_p0, %p2218_p13 }
  0x4f   : > { %2226 = shalt.err (!%p2223_p2)
}
  0x50   : > { %s2227_s17 = scalar_lea.vmem %s2630_s20, 16  ;;  %s2234_s11 = scalar_lea.vmem %s2630_s20, 32 }
  0x51   : > { %p2228_p5 = scmp.ne.s32.totalorder %s2630_s20, %s2227_s17  ;;  %p2235_p4 = scmp.lt.s32.totalorder %s2630_s20, %s2630_s20 }
  0x52   : > { %p2236_p10 = scmp.lt.s32.totalorder %s2234_s11, %s2227_s17 }
  0x53   : > { %p2230_p7 = pnand %p2228_p5, %p2640_p8 }
  0x54   : > { %p2237_p11 = por %p2236_p10, %p2235_p4 }
  0x55   : > { %p2231_p9 = pneg %p2230_p7 }
  0x57   : > { %p2238_p12 = pnand %p2237_p11, %p2231_p9 }
  0x59   : > { %2241 = shalt.err (!%p2238_p12)
}
  0x5a   : > { %2071 = dma.hbm_to_vmem [thread:$0]  (!%p2624_p6), %s3087_s6, 16, %s2630_s20, [#allocation12]  }
  0x5b   : > { %s2501_s12 = smov [#allocation14]   ;;  %s2502_s24 = smov [#allocation7]  }
  0x5c   : > { %s432_s23 = sshll.u32 %s2501_s12, 4  ;;  %s370_s29 = sshll.u32 %s2502_s24, 4  ;;  %s433_s23 = int_to_ptr.vmem [resolvable:$true] %s432_s23  ;;  %s371_s29 = int_to_ptr.vmem [resolvable:$true] %s370_s29 }
  0x5d   : > { %s2242_s30 = scalar_lea.hbm %s3090_s9, 256 }
  0x5e   : > { %p2243_p13 = scmp.ne.s32.totalorder %s3090_s9, %s2242_s30  ;;  %p2249_p5 = scmp.lt.u32.totalorder %s2242_s30, %s3090_s9 }
  0x60   : > { %p2245_p0 = pnand %p2243_p13, %p2640_p8 }
  0x62   : > { %p2246_p2 = pneg %p2245_p0 }
  0x64   : > { %p2251_p7 = pnand %p2249_p5, %p2246_p2 }
  0x66   : > { %2254 = shalt.err (!%p2251_p7)
}
  0x67   : > { %s2255_s20 = scalar_lea.vmem %s433_s23, 256  ;;  %p2263_p11 = scmp.lt.s32.totalorder %s433_s23, %s433_s23 }
  0x68   : > { %p2256_p9 = scmp.ne.s32.totalorder %s433_s23, %s2255_s20  ;;  %p2264_p12 = scmp.lt.s32.totalorder %s2255_s20, %s2255_s20 }
  0x6a   : > { %p2258_p4 = pnand %p2256_p9, %p2640_p8  ;;  %p2265_p1 = por %p2264_p12, %p2263_p11 }
  0x6c   : > { %p2259_p10 = pneg %p2258_p4 }
  0x6e   : > { %p2266_p3 = pnand %p2265_p1, %p2259_p10 }
  0x70   : > { %2269 = shalt.err (!%p2266_p3)
}
  0x71   : > { %s3113_s7 = smov 128   ;;  %s2270_s21 = scalar_lea.hbm %s3084_s3, 512 }
  0x72   : > { %2077 = dma.hbm_to_vmem [thread:$0]  (!%p2624_p6), %s3090_s9, 256, %s433_s23, [#allocation15], %s3113_s7, %s3113_s7, %s2500_s13  }
  0x73   : > { %p2271_p1 = scmp.ne.s32.totalorder %s3084_s3, %s2270_s21  ;;  %p2277_p0 = scmp.lt.u32.totalorder %s2270_s21, %s3084_s3 }
  0x75   : > { %p2273_p3 = pnand %p2271_p1, %p2640_p8 }
  0x77   : > { %p2274_p13 = pneg %p2273_p3 }
  0x79   : > { %p2279_p2 = pnand %p2277_p0, %p2274_p13 }
  0x7b   : > { %2282 = shalt.err (!%p2279_p2)
}
  0x7c   : > { %s2283_s20 = scalar_lea.vmem %s371_s29, 512  ;;  %p2291_p4 = scmp.lt.s32.totalorder %s371_s29, %s371_s29 }
  0x7d   : > { %p2284_p5 = scmp.ne.s32.totalorder %s371_s29, %s2283_s20  ;;  %p2292_p10 = scmp.lt.s32.totalorder %s2283_s20, %s2283_s20 }
  0x7f   : > { %p2286_p7 = pnand %p2284_p5, %p2640_p8  ;;  %p2293_p11 = por %p2292_p10, %p2291_p4 }
  0x81   : > { %p2287_p9 = pneg %p2286_p7 }
  0x83   : > { %p2294_p12 = pnand %p2293_p11, %p2287_p9 }
  0x85   : > { %2297 = shalt.err (!%p2294_p12)
}
  0x86   : > { %2062 = dma.hbm_to_vmem [thread:$0]  (!%p2624_p6), %s3084_s3, 512, %s371_s29, [#allocation6], %s3113_s7, %s3113_s7, %s2500_s13  }
  0x87   : > { %s2503_s12 = smov [#allocation10]   ;;  %s2504_s19 = smov [#allocation13]  }
  0x88   : > { %s394_s24 = sshll.u32 %s2503_s12, 4  ;;  %s422_s21 = sshll.u32 %s2504_s19, 4  ;;  %s395_s24 = int_to_ptr.vmem [resolvable:$true] %s394_s24  ;;  %s423_s21 = int_to_ptr.vmem [resolvable:$true] %s422_s21 }
  0x89   : > { %s2298_s11 = scalar_lea.hbm %s3086_s5, 512 }
  0x8a   : > { %p2299_p1 = scmp.ne.s32.totalorder %s3086_s5, %s2298_s11  ;;  %p2305_p0 = scmp.lt.u32.totalorder %s2298_s11, %s3086_s5 }
  0x8c   : > { %p2301_p3 = pnand %p2299_p1, %p2640_p8 }
  0x8e   : > { %p2302_p13 = pneg %p2301_p3 }
  0x90   : > { %p2307_p2 = pnand %p2305_p0, %p2302_p13 }
  0x92   : > { %2310 = shalt.err (!%p2307_p2)
}
  0x93   : > { %s2311_s29 = scalar_lea.vmem %s395_s24, 512  ;;  %p2319_p4 = scmp.lt.s32.totalorder %s395_s24, %s395_s24 }
  0x94   : > { %p2312_p5 = scmp.ne.s32.totalorder %s395_s24, %s2311_s29  ;;  %p2320_p10 = scmp.lt.s32.totalorder %s2311_s29, %s2311_s29 }
  0x96   : > { %p2314_p7 = pnand %p2312_p5, %p2640_p8  ;;  %p2321_p11 = por %p2320_p10, %p2319_p4 }
  0x98   : > { %p2315_p9 = pneg %p2314_p7 }
  0x9a   : > { %p2322_p12 = pnand %p2321_p11, %p2315_p9 }
  0x9c   : > { %2325 = shalt.err (!%p2322_p12)
}
  0x9d   : > { %2068 = dma.hbm_to_vmem [thread:$0]  (!%p2624_p6), %s3086_s5, 512, %s395_s24, [#allocation9], %s3113_s7, %s3113_s7, %s2500_s13  }
  0x9e   : > { %s2326_s30 = scalar_lea.hbm %s3089_s8, 16 }
  0x9f   : > { %p2327_p1 = scmp.ne.s32.totalorder %s3089_s8, %s2326_s30  ;;  %p2333_p0 = scmp.lt.u32.totalorder %s2326_s30, %s3089_s8 }
  0xa1   : > { %p2329_p3 = pnand %p2327_p1, %p2640_p8 }
  0xa3   : > { %p2330_p13 = pneg %p2329_p3 }
  0xa5   : > { %p2335_p2 = pnand %p2333_p0, %p2330_p13 }
  0xa7   : > { %2338 = shalt.err (!%p2335_p2)
}
  0xa8   : > { %s2339_s23 = scalar_lea.vmem %s423_s21, 16  ;;  %s2346_s13 = scalar_lea.vmem %s423_s21, 32 }
  0xa9   : > { %p2340_p5 = scmp.ne.s32.totalorder %s423_s21, %s2339_s23  ;;  %p2347_p4 = scmp.lt.s32.totalorder %s423_s21, %s423_s21 }
  0xaa   : > { %p2348_p10 = scmp.lt.s32.totalorder %s2346_s13, %s2339_s23 }
  0xab   : > { %p2342_p7 = pnand %p2340_p5, %p2640_p8 }
  0xac   : > { %p2349_p11 = por %p2348_p10, %p2347_p4 }
  0xad   : > { %p2343_p9 = pneg %p2342_p7 }
  0xaf   : > { %p2350_p12 = pnand %p2349_p11, %p2343_p9 }
  0xb1   : > { %2353 = shalt.err (!%p2350_p12)
}
  0xb2   : > { %2074 = dma.hbm_to_vmem [thread:$0]  (!%p2624_p6), %s3089_s8, 16, %s423_s21, [#allocation12]  }
  0xb3   : > { %s2505_s29 = smov [#allocation16]   ;;  %s2354_s19 = scalar_lea.hbm %s3091_s10, 16 }
  0xb4   : > { %s446_s1 = sshll.u32 %s2505_s29, 4  ;;  %p2355_p1 = scmp.ne.s32.totalorder %s3091_s10, %s2354_s19  ;;  %s447_s1 = int_to_ptr.vmem [resolvable:$true] %s446_s1 }
  0xb5   : > { %p2361_p0 = scmp.lt.u32.totalorder %s2354_s19, %s3091_s10 }
  0xb6   : > { %p2357_p3 = pnand %p2355_p1, %p2640_p8 }
  0xb8   : > { %p2358_p13 = pneg %p2357_p3 }
  0xba   : > { %p2363_p2 = pnand %p2361_p0, %p2358_p13 }
  0xbc   : > { %2366 = shalt.err (!%p2363_p2)
}
  0xbd   : > { %s2367_s21 = scalar_lea.vmem %s447_s1, 16  ;;  %s2374_s20 = scalar_lea.vmem %s447_s1, 32 }
  0xbe   : > { %p2368_p5 = scmp.ne.s32.totalorder %s447_s1, %s2367_s21  ;;  %p2375_p4 = scmp.lt.s32.totalorder %s447_s1, %s447_s1 }
  0xbf   : > { %p2376_p10 = scmp.lt.s32.totalorder %s2374_s20, %s2367_s21 }
  0xc0   : > { %p2370_p7 = pnand %p2368_p5, %p2640_p8 }
  0xc1   : > { %p2377_p11 = por %p2376_p10, %p2375_p4 }
  0xc2   : > { %p2371_p9 = pneg %p2370_p7 }
  0xc4   : > { %p2378_p12 = pnand %p2377_p11, %p2371_p9 }
  0xc6   : > { %2381 = shalt.err (!%p2378_p12)
}
  0xc7   : > { %2080 = dma.hbm_to_vmem [thread:$0]  (!%p2624_p6), %s3091_s10, 16, %s447_s1, [#allocation15]  }
  0xc8   : > { %s1811_s16 = sadd.s32 4294967294, %s2494_s28   ;;  %s2813_s18 = sadd.s32 1, %s2494_s28  }
  0xc9   : > { %s37_s7 = ssub.s32 %s2494_s28, %s2813_s18  ;;  %s40_s24 = sadd.s32 1, %s2490_s27 }
  0xca   : > { %p38_p8 = scmp.eq.s32.totalorder %s37_s7, 0  ;;  %p47_p1 = scmp.ne.s32.totalorder %s2490_s27, %s2486_s26 }
  0xcb   : > { %p48_p3 = scmp.eq.s32.totalorder %s2494_s28, 0  ;;  %p53_p13 = scmp.ne.s32.totalorder %s2486_s26, %s2482_s25 }
  0xcc   : > { %s2824_s29 = scalar_select %p38_p8, %s2490_s27, %s40_s24  }
  0xcd   : > { %p2826_p0 = por %p48_p3, %p47_p1  ;;  %p3115_p2 = scmp.eq.s32.totalorder %s2608_s14, 0 }
  0xce   : > { %p329_p5 = scmp.eq.s32.totalorder %s2608_s14, 1  ;;  %p335_p7 = scmp.eq.s32.totalorder %s1811_s16, 1 }
  0xcf   : > { %p2832_p6 = por %p3115_p2, %p53_p13  ;;  %p2097_p9 = scmp.lt.s32.totalorder %s2494_s28, 2 }
  0xd0   : > { %s463_s12 = sand.u32 1, %s2490_s27   ;;  %p2839_p4 = por %p329_p5, %p47_p1 }
  0xd1   : > { %p2843_p10 = por %p335_p7, %p53_p13  ;;  %s1822_s17 = sshll.u32 %s463_s12, 3 }
  0xd2   : > { %s3117_s19 = scalar_select %p2839_p4, 1, 0 }
  0xd3   : > { %s3118_s30 = scalar_select %p2843_p10, 1, 0 }
  0xd4   : > { %s1823_s11 = sshll.u32 %s2494_s28, 7  ;;  %s467_s23 = scalar_lea.vmem [#allocation2], %s1822_s17 }
  0xd5   : > { %s2851_s20 = scalar_lea.hbm %s3081_s0, %s1823_s11  ;;  %s474_s13 = sshll.u32 %s467_s23, 4  ;;  %s2853_s13 = int_to_ptr.vmem [resolvable:$true] %s474_s13 }
  0xd6   : > { %p2857_p11 = pnand %p2097_p9, %p2826_p0  ;;  %s464_s7 = scalar_lea.sflag [#allocation3], %s463_s12 }
  0xd7   : > { %s2382_s24 = scalar_lea.hbm %s2851_s20, 128  ;;  %s2387_s2 = scalar_lea.hbm %s3081_s0, 256 }
  0xd8   : > { %p2383_p12 = scmp.ne.s32.totalorder %s2851_s20, %s2382_s24  ;;  %p2384_p8 = pneg %p2857_p11 }
  0xd9   : > { %p2388_p13 = scmp.lt.u32.totalorder %s2851_s20, %s3081_s0  ;;  %p2389_p0 = scmp.lt.u32.totalorder %s2387_s2, %s2382_s24 }
  0xda   : > { %p2385_p1 = pnand %p2384_p8, %p2383_p12  ;;  %p2391_p5 = scmp.lt.u32.totalorder %s2382_s24, %s2851_s20 }
  0xdb   : > { %p2390_p2 = por %p2389_p0, %p2388_p13 }
  0xdc   : > { %p2386_p3 = pneg %p2385_p1 }
  0xdd   : > { %p2392_p7 = por %p2391_p5, %p2390_p2 }
  0xdf   : > { %p2393_p9 = pnand %p2392_p7, %p2386_p3 }
  0xe1   : > { %2396 = shalt.err (!%p2393_p9)
}
  0xe2   : > { %s2397_s12 = scalar_lea.vmem %s2853_s13, 128  ;;  %s2506_s23 = smov [#allocation2]  }
  0xe3   : > { %p2398_p12 = scmp.ne.s32.totalorder %s2853_s13, %s2397_s12  ;;  %s2402_s17 = sshll.u32 %s2506_s23, 4  ;;  %s2403_s17 = int_to_ptr.vmem [resolvable:$false] %s2402_s17 }
  0xe4   : > { %s2404_s11 = scalar_lea.vmem %s2403_s17, 256  ;;  %p2405_p4 = scmp.lt.s32.totalorder %s2853_s13, %s2403_s17 }
  0xe5   : > { %p2400_p1 = pnand %p2398_p12, %p2384_p8  ;;  %p2406_p13 = scmp.lt.s32.totalorder %s2404_s11, %s2397_s12 }
  0xe7   : > { %p2401_p10 = pneg %p2400_p1  ;;  %p2407_p0 = por %p2406_p13, %p2405_p4 }
  0xe9   : > { %p2408_p2 = pnand %p2407_p0, %p2401_p10 }
  0xeb   : > { %2411 = shalt.err (!%p2408_p2)
}
  0xec   : > { %2084 = dma.hbm_to_vmem [thread:$0]  (!%p2857_p11), %s2851_s20, 128, %s2853_s13, %s464_s7  }
  0xed   : > { %p3120_p3 = scmp.ne.s32.totalorder %s3109_s15, 0 }
  0xee   : > { %s2889_s24 = sand.u32 (!%p3120_p3), 1, %s2486_s26  }
  0xef   : > { %483 = sbr.rel (%p3120_p3) target bundleno = 2641 (0xa51), region = 72  ;;  %s1825_s2 = sshll.u32 (!%p3120_p3), %s2889_s24, 3 }
  0xf0   : > { %s486_s22 = scalar_lea.sflag (!%p3120_p3), [#allocation3], %s2889_s24  ;;  %s489_s21 = scalar_lea.vmem (!%p3120_p3), [#allocation2], %s1825_s2 }
  0xf6   : > { %2457 = dma.done.wait (%p2832_p6), %s486_s22, 128  }
  0xf7   : > { %2459 = vsyncadd (%p2832_p6), %s486_s22, 4294967168  ;;  %p3121_p4 = scmp.eq.s32.totalorder %s2608_s14, 0 }
  0xf9   : > { %2461 = dma.done.wait (%p3121_p4), [#allocation6], 1024   ;;  %p3122_p10 = pmov %p3121_p4 }
  0xfa   : > { %p3123_p11 = pmov %p3121_p4 }
  0xfb   : > { %2463 = vsyncadd (%p3122_p10), [#allocation6], 4294966272 }
  0xfc   : > { %2465 = dma.done.wait (%p3123_p11), [#allocation9], 528   ;;  %p3124_p8 = pmov %p3121_p4 }
  0xfd   : > { %p3125_p5 = pmov %p3121_p4 }
  0xfe   : > { %2467 = vsyncadd (%p3124_p8), [#allocation9], 4294966768 }
  0xff   : > { %2469 = dma.done.wait (%p3125_p5), [#allocation12], 32   ;;  %p3126_p7 = pmov %p3121_p4 }
 0x100   : > { %p3127_p6 = pmov %p3121_p4 }
 0x101   : > { %2471 = vsyncadd (%p3126_p7), [#allocation12], 4294967264 }
 0x102   : > { %2473 = dma.done.wait (%p3127_p6), [#allocation15], 272   ;;  %p3128_p9 = pmov %p3121_p4 }
 0x103   : > { %v2507_v0 = vmov 0.0|0.0   ;;  %vm2508_vm0 = vmmov 0   ;;  %v2509_v1 = vmov 0.0   ;;  %v565_v2 = vld [vmem:[#allocation5] sm:$0xff]  ;;  %v566_v3 = vld [vmem:[#allocation5 + $0x8] sm:$0xff]  ;;  %v567_v4 = vld [vmem:[#allocation5 + $0x10] sm:$0xff]  ;;  %v777_v28 = vlaneseq }
 0x104   : > { %2475 = vsyncadd (%p3128_p9), [#allocation15], 4294967024  ;;  %1988 = vmatprep.subr.bf16.mxu0 %v2507_v0  ;;  %1923 = vmatprep.mubr.msk.f32.mxu0 %vm2508_vm0, %v2509_v1  ;;  %v1989_v5 = vpack.c.bf16 %v566_v3, %v565_v2  ;;  %v568_v6 = vld [vmem:[#allocation5 + $0x18] sm:$0xff]  ;;  %vm570_vm1 = vcmask 261120   ;;  %v670_v9 = vld [vmem:[#allocation7] sm:$0xff]  ;;  %vm655_vm2 = vcmask 1046528  }
 0x105   : > { %1994 = vmatprep.subr.bf16.mxu1 %v2507_v0  ;;  %1934 = vmatprep.mubr.msk.f32.mxu1 %vm2508_vm0, %v2509_v1  ;;  %v1992_v7 = vpack.c.bf16 %v568_v6, %v567_v4  ;;  %v564_v8 = vld [vmem:[%s489_s21] sm:$0xff]  ;;  %v671_v10 = vld [vmem:[#allocation7 + $0x8] sm:$0xff]  ;;  %s2510_s15 = smov 96   ;;  %s2511_s1 = smov 64   ;;  %vm647_vm3 = vcmask 1040384   ;;  %v781_v29 = vand.u32 127, %v777_v28 }
 0x106   : > { %1990 = vmatpush3.bf16.msra.mxu0 %v1989_v5  ;;  %v1995_v11 = vpack.c.bf16 %v671_v10, %v670_v9  ;;  %v672_v12 = vld [vmem:[#allocation7 + $0x10] sm:$0xff]  ;;  %v673_v13 = vld [vmem:[#allocation7 + $0x18] sm:$0xff]  ;;  %s3129_s16 = sld [smem:[#allocation25_spill]]  ;;  %v2923_v30 = vshrl.u32 %v777_v28, 7  ;;  %vm795_vm7 = vcmask 64512   ;;  %v772_v47 = vld [vmem:[#allocation10] sm:$0xff] }
 0x107   : > { %1991 = vmatprep.subr.bf16.mxu0 %v2507_v0  ;;  %v1998_v14 = vpack.c.bf16 %v673_v13, %v672_v12  ;;  %v2925_v31 = vmul.u32 2, %v781_v29  ;;  %v1838_v44 = vld [vmem:[#allocation8] ss:$0 sm:$0xff]  ;;  %v773_v48 = vld [vmem:[#allocation10 + $0x8] sm:$0xff]  ;;  %v774_v50 = vld [vmem:[#allocation10 + $0x10] sm:$0xff]  ;;  %s3130_s23 = sld [smem:[#allocation26_spill]] }
 0x108   : > { %1996 = vmatpush3.bf16.msra.mxu1 %v1995_v11  ;;  %v779_v38 = vadd.s32 8, %v2923_v30  ;;  %v775_v51 = vld [vmem:[#allocation10 + $0x18] sm:$0xff]  ;;  %v2000_v53 = vpack.c.bf16 %v773_v48, %v772_v47  ;;  %s2512_s2 = smov 112   ;;  %v1845_v12 = vld [vmem:[#allocation11] ss:$0 sm:$0xff]  ;;  %vm1001_vm11 = vcmask 130048  }
 0x109   : > { %1997 = vmatprep.subr.bf16.mxu1 %v2507_v0  ;;  %v783_v32 = vsub.s32 %v2923_v30, %v2925_v31  ;;  %v2004_v55 = vpack.c.bf16 %v775_v51, %v774_v50  ;;  %s2513_s7 = smov 120   ;;  %s1834_s12 = sshll.u32 %s2889_s24, 5 }
 0x10a   : > { %1993 = vmatpush3.bf16.msra.mxu0 %v1992_v7  ;;  %v784_v41 = vsub.s32 %v779_v38, %v2925_v31  ;;  %s563_s22 = scalar_lea.vmem [#allocation17], %s1834_s12  ;;  %s1874_s21 = sshll.u32 %s2608_s14, 9 }
 0x10b   : > { %vm785_vm4 = vcmp.eq.s32.totalorder %v783_v32, 0  ;;  %vm787_vm5 = vcmp.eq.s32.totalorder %v783_v32, 1  ;;  %v1123_v32 = vld [vmem:[#allocation14] sm:$0xff]  ;;  %s1649_s14 = scalar_lea.sflag [#allocation4], %s2889_s24  ;;  %p3134_p1 = scmp.ne.s32.totalorder %s3117_s19, 0 }
 0x10c   : > { %1999 = vmatpush3.bf16.msra.mxu1 %v1998_v14  ;;  %v1836_v23 = vld [vmem:[%s3129_s16] ss:$0 sm:$0xff]  ;;  %vm789_vm6 = vmor %vm785_vm4, %vm787_vm5  ;;  %vm786_vm8 = vcmp.eq.s32.totalorder %v784_v41, 0  ;;  %vm788_vm9 = vcmp.eq.s32.totalorder %v784_v41, 1  ;;  %v1848_v41 = vld [vmem:[#allocation13] ss:$0 sm:$0xff] }
 0x10d   : > { %1924 = vmatmul.mubr.msk.f32.vlgmr.msra.gmra.mrb[0].mxu0 %vm570_vm1, %v564_v8  ;;  %v2930_v33 = vsel %vm789_vm6, 1.0, %v2509_v1  ;;  %vm790_vm10 = vmor %vm786_vm8, %vm788_vm9  ;;  %v998_v58 = vld [vmem:[%s3130_s23] sm:$0xff]  ;;  %v999_v59 = vld [vmem:[%s3130_s23 + $0x8] sm:$0xff]  ;;  %s3133_s16 = sld [smem:[#allocation29_spill]]  ;;  %s2514_s17 = smov [#allocation17]  }
 0x10e   : > { %v2940_v54 = vsel %vm790_vm10, 1.0, %v2509_v1  ;;  %v2008_v60 = vpack.c.bf16 %v999_v59, %v998_v58  ;;  %s2416_s11 = sshll.u32 %s2514_s17, 4  ;;  %s2417_s11 = int_to_ptr.vmem [resolvable:$false] %s2416_s11 }
 0x110   : > { %2009 = vmatprep.subr.bf16.mxu0 %v2008_v60 }
 0x111   : > { %2011 = vmatpush3.bf16.msra.mxu0 %v2008_v60 }
 0x1e0   : > { %v640_v15 = vpop.f32.mrb[0].mxu0 }
 0x1e1   : > { %v653_v16 = vrot.slane %v640_v15, 1  ;;  %649 = vrot.lane.b32.xlu0 %v640_v15, %s2510_s15  ;;  %v1925_v17 = vpop.f32.mrb[1].mxu0  ;;  %v645_v19 = vrot.slane %v640_v15, 7 }
 0x1e3   : > { %v656_v18 = vsel %vm655_vm2, %v653_v16, 0.0  ;;  %v648_v21 = vsel %vm647_vm3, 0.0, %v645_v19 }
 0x1e5   : > { %658 = vrot.lane.b32.xlu0 %v656_v18, %s2511_s1 }
 0x253   : > { %v650_v20 = vpop.permute.xlu0 %649 }
 0x254   : > { %v652_v22 = vadd.f32 %v650_v20, %v648_v21 }
 0x257   : > { %v659_v24 = vpop.permute.xlu0 %658 }
 0x258   : > { %v661_v25 = vadd.f32 %v659_v24, %v652_v22 }
 0x25a   : > { %v668_v26 = vadd.f32 %v1836_v23, %v661_v25 }
 0x25c   : > { %v669_v27 = vmax.f32 %v668_v26, 0.0 }
 0x25e   : > { %1935 = vmatmul.mubr.msk.f32.vlgmr.msra.gmra.mrb[0].mxu1 %vm570_vm1, %v669_v27 }
 0x25f   : > { %1939 = vmatprep.mubr.msk.f32.mxu1 %vm795_vm7, %v2930_v33 }
 0x331   : > { %v744_v34 = vpop.f32.mrb[0].mxu1 }
 0x332   : > { %v756_v35 = vrot.slane %v744_v34, 1  ;;  %752 = vrot.lane.b32.xlu1 %v744_v34, %s2510_s15  ;;  %v1936_v36 = vpop.f32.mrb[1].mxu1  ;;  %v749_v39 = vrot.slane %v744_v34, 7 }
 0x334   : > { %v758_v37 = vsel %vm655_vm2, %v756_v35, 0.0  ;;  %v751_v42 = vsel %vm647_vm3, 0.0, %v749_v39 }
 0x336   : > { %760 = vrot.lane.b32.xlu1 %v758_v37, %s2511_s1  ;;  %v1126_v37 = vadd.s32 16, %v2923_v30  ;;  %s1662_s1 = sshll.u32 %s563_s22, 4  ;;  %s3037_s1 = int_to_ptr.vmem [resolvable:$true] %s1662_s1 }
 0x337   : > { %s2412_s12 = scalar_lea.vmem %s3037_s1, 512  ;;  %p2419_p2 = scmp.lt.s32.totalorder %s3037_s1, %s2417_s11 }
 0x338   : > { %v1128_v47 = vsub.s32 %v1126_v37, %v2925_v31  ;;  %p2413_p12 = scmp.ne.s32.totalorder %s3037_s1, %s2412_s12 }
 0x33a   : > { %vm1130_vm12 = vcmp.eq.s32.totalorder %v1128_v47, 0  ;;  %vm1132_vm13 = vcmp.eq.s32.totalorder %v1128_v47, 1  ;;  %p2414_p13 = pnand %p2413_p12, %p3134_p1 }
 0x33b   : > { %vm1134_vm14 = vmor %vm1130_vm12, %vm1132_vm13 }
 0x33c   : > { %p2415_p0 = pneg %p2414_p13 }
 0x3a4   : > { %v753_v40 = vpop.permute.xlu1 %752 }
 0x3a5   : > { %v755_v43 = vadd.f32 %v753_v40, %v751_v42 }
 0x3a8   : > { %v761_v45 = vpop.permute.xlu1 %760 }
 0x3a9   : > { %v763_v46 = vadd.f32 %v761_v45, %v755_v43  ;;  %v1127_v45 = vadd.s32 24, %v2923_v30 }
 0x3ab   : > { %v770_v49 = vadd.f32 %v1838_v44, %v763_v46  ;;  %v1129_v51 = vsub.s32 %v1127_v45, %v2925_v31 }
 0x3ad   : > { %v771_v52 = vmax.f32 %v770_v49, 0.0  ;;  %vm1131_vm15 = vcmp.eq.s32.totalorder %v1129_v51, 0  ;;  %vm1133_vm0 = vcmp.eq.s32.totalorder %v1129_v51, 1 }
 0x3af   : > { %1937 = vmatprep.subr.mxu1 %v771_v52 }
 0x3b0   : > { %1938 = vmatpush3.msra.mxu1 %v771_v52 }
 0x3b1   : > { %1940 = vmatmul.mubr.msk.f32.vlgmr.msra.gmra.mrb[2].mxu1 %vm795_vm7, %v2940_v54  ;;  %2001 = vmatprep.subr.bf16.mxu1 %v2000_v53 }
 0x3b2   : > { %2003 = vmatpush3.bf16.msra.mxu1 %v2000_v53 }
 0x3b3   : > { %2005 = vmatprep.subr.bf16.mxu1 %v2004_v55 }
 0x3b6   : > { %2007 = vmatpush3.bf16.msra.mxu1 %v2004_v55  ;;  %v1849_v55 = vsel %vm1134_vm14, 1.0, %v2509_v1 }
 0x484   : > { %v1941_v56 = vpop.f32.mrb[2].mxu1 }
 0x485   : > { %v868_v57 = vpop.f32.mrb[3].mxu1 }
 0x486   : > { %1950 = vmatprep.mubr.msk.f32.mxu1 %vm570_vm1, %v868_v57 }
 0x487   : > { %1951 = vmatmul.mubr.msk.f32.vlgmr.msra.gmra.mrb[4].mxu1 %vm570_vm1, %v1941_v56  ;;  %vm1135_vm1 = vmor %vm1131_vm15, %vm1133_vm0 }
 0x488   : > { %v1850_v30 = vsel %vm1135_vm1, 1.0, %v2509_v1 }
 0x55a   : > { %v1952_v61 = vpop.f32.mrb[4].mxu1 }
 0x55b   : > { %v961_v62 = vrot.slane %v1952_v61, 7  ;;  %v975_v63 = vrot.slane %v1952_v61, 1  ;;  %968 = vrot.lane.b32.xlu1 %v1952_v61, %s2512_s2  ;;  %v949_v0 = vpop.f32.mrb[5].mxu1 }
 0x55c   : > { %v960_v2 = vrot.slane %v949_v0, 7  ;;  %v974_v3 = vrot.slane %v949_v0, 1  ;;  %966 = vrot.lane.b32.xlu0 %v949_v0, %s2512_s2 }
 0x55d   : > { %v978_v4 = vsel %vm655_vm2, %v975_v63, 0.0 }
 0x55e   : > { %v976_v5 = vsel %vm655_vm2, %v974_v3, %v975_v63  ;;  %v962_v6 = vsel %vm647_vm3, %v960_v2, %v961_v62  ;;  %v965_v10 = vsel %vm647_vm3, 0.0, %v960_v2 }
 0x55f   : > { %982 = vrot.lane.b32.xlu1 %v978_v4, %s2510_s15 }
 0x560   : > { %980 = vrot.lane.b32.xlu0 %v976_v5, %s2510_s15 }
 0x5cd   : > { %v969_v7 = vpop.permute.xlu1 %968 }
 0x5ce   : > { %v967_v8 = vpop.permute.xlu0 %966  ;;  %v973_v9 = vadd.f32 %v969_v7, %v962_v6 }
 0x5cf   : > { %v972_v11 = vadd.f32 %v967_v8, %v965_v10 }
 0x5d1   : > { %v983_v13 = vpop.permute.xlu1 %982 }
 0x5d2   : > { %v987_v14 = vadd.f32 %v983_v13, %v973_v9  ;;  %v981_v15 = vpop.permute.xlu0 %980 }
 0x5d3   : > { %v986_v16 = vadd.f32 %v981_v15, %v972_v11 }
 0x5d4   : > { %v995_v17 = vadd.f32 %v1845_v12, %v987_v14 }
 0x5d5   : > { %v994_v18 = vadd.f32 %v1845_v12, %v986_v16 }
 0x5d6   : > { %v997_v20 = vmax.f32 %v995_v17, 0.0 }
 0x5d7   : > { %v996_v19 = vmax.f32 %v994_v18, 0.0 }
 0x5d9   : > { %1957 = vmatprep.mubr.msk.f32.mxu0 %vm1001_vm11, %v996_v19 }
 0x5da   : > { %1958 = vmatmul.mubr.msk.f32.vlgmr.msra.gmra.mrb[2].mxu0 %vm1001_vm11, %v997_v20  ;;  %v1859_v20 = vld [vmem:[#allocation16] ss:$0 sm:$0xff] }
 0x5db   : > { %1964 = vmatprep.mubr.msk.f32.mxu0 %vm1001_vm11, %v2930_v33  ;;  %v1124_v33 = vld [vmem:[#allocation14 + $0x8] sm:$0xff] }
 0x5dc   : > { %v2016_v34 = vpack.c.bf16 %v1124_v33, %v1123_v32 }
 0x5de   : > { %2017 = vmatprep.subr.bf16.mxu1 %v2016_v34 }
 0x5df   : > { %2019 = vmatpush3.bf16.msra.mxu1 %v2016_v34 }
 0x6ad   : > { %v1959_v21 = vpop.f32.mrb[2].mxu0 }
 0x6ae   : > { %v1086_v22 = vrot.slane %v1959_v21, 7  ;;  %v1100_v23 = vrot.slane %v1959_v21, 1  ;;  %1093 = vrot.lane.b32.xlu1 %v1959_v21, %s2512_s2  ;;  %v1074_v24 = vpop.f32.mrb[3].mxu0 }
 0x6af   : > { %v1085_v25 = vrot.slane %v1074_v24, 7  ;;  %v1099_v26 = vrot.slane %v1074_v24, 1  ;;  %1091 = vrot.lane.b32.xlu0 %v1074_v24, %s2512_s2 }
 0x6b0   : > { %v1103_v27 = vsel %vm655_vm2, %v1100_v23, 0.0 }
 0x6b1   : > { %v1101_v28 = vsel %vm655_vm2, %v1099_v26, %v1100_v23  ;;  %v1087_v29 = vsel %vm647_vm3, %v1085_v25, %v1086_v22  ;;  %v1090_v39 = vsel %vm647_vm3, 0.0, %v1085_v25 }
 0x6b2   : > { %1107 = vrot.lane.b32.xlu1 %v1103_v27, %s2510_s15 }
 0x6b3   : > { %1105 = vrot.lane.b32.xlu0 %v1101_v28, %s2510_s15  ;;  %s3131_s15 = sld [smem:[#allocation27_spill]] }
 0x6b9   : > { %v1404_v59 = vld [vmem:[%s3131_s15] sm:$0xff]  ;;  %v1406_v60 = vld [vmem:[%s3131_s15 + $0x10] sm:$0xff] }
 0x6ba   : > { %1980 = vmatprep.subr.mxu1 %v1406_v60 }
 0x720   : > { %v1094_v35 = vpop.permute.xlu1 %1093 }
 0x721   : > { %v1092_v36 = vpop.permute.xlu0 %1091  ;;  %v1098_v38 = vadd.f32 %v1094_v35, %v1087_v29 }
 0x722   : > { %v1097_v40 = vadd.f32 %v1092_v36, %v1090_v39 }
 0x724   : > { %v1108_v42 = vpop.permute.xlu1 %1107 }
 0x725   : > { %v1112_v43 = vadd.f32 %v1108_v42, %v1098_v38  ;;  %v1106_v44 = vpop.permute.xlu0 %1105 }
 0x726   : > { %v1111_v46 = vadd.f32 %v1106_v44, %v1097_v40 }
 0x727   : > { %v1120_v48 = vadd.f32 %v1848_v41, %v1112_v43 }
 0x728   : > { %v1119_v49 = vadd.f32 %v1848_v41, %v1111_v46 }
 0x729   : > { %v1122_v50 = vmax.f32 %v1120_v48, 0.0 }
 0x72a   : > { %v1121_v52 = vmax.f32 %v1119_v49, 0.0 }
 0x72c   : > { %v2012_v53 = vpack.c.bf16 %v1122_v50, %v1121_v52 }
 0x72e   : > { %2013 = vmatprep.subr.bf16.mxu0 %v2012_v53 }
 0x72f   : > { %2015 = vmatpush3.bf16.msra.mxu0 %v2012_v53 }
 0x732   : > { %1965 = vmatmul.mubr.msk.f32.vlgmr.msra.gmra.mrb[4].mxu0 %vm1001_vm11, %v2940_v54  ;;  %v1405_v54 = vld [vmem:[%s3131_s15 + $0x8] sm:$0xff] }
 0x733   : > { %1967 = vmatprep.mubr.msk.f32.mxu0 %vm1001_vm11, %v1849_v55  ;;  %1420 = vmatprep.subr.mxu0 %v1405_v54 }
 0x734   : > { %1421 = vmatpush1.msra.mxu0 %v1404_v59 }
 0x736   : > { %1968 = vmatmul.mubr.msk.f32.gmra.mrb[6].mxu0 %vm1001_vm11, %v1850_v30 }
 0x737   : > { %1484 = vmatprep.mubr.f32.mxu0 %v2509_v1 }
 0x805   : > { %v1966_v31 = vpop.f32.mrb[4].mxu0 }
 0x806   : > { %v1216_v56 = vpop.f32.mrb[5].mxu0 }
 0x807   : > { %1974 = vmatprep.mubr.msk.f32.mxu1 %vm1001_vm11, %v1216_v56 }
 0x808   : > { %1975 = vmatmul.mubr.msk.f32.vlgmr.msra.gmra.mrb[6].mxu1 %vm1001_vm11, %v1966_v31 }
 0x809   : > { %v1969_v57 = vpop.f32.mrb[6].mxu0  ;;  %1981 = vmatpush3.msra.mxu1 %v1406_v60 }
 0x80a   : > { %v1226_v58 = vpop.f32.mrb[7].mxu0 }
 0x80b   : > { %1977 = vmatprep.mubr.msk.f32.mxu1 %vm1001_vm11, %v1226_v58 }
 0x80c   : > { %1978 = vmatmul.mubr.msk.f32.gmra.mrb[8].mxu1 %vm1001_vm11, %v1969_v57 }
 0x8db   : > { %v1976_v61 = vpop.f32.mrb[6].mxu1 }
 0x8dc   : > { %v1337_v62 = vrot.slane %v1976_v61, 7  ;;  %v1365_v63 = vrot.slane %v1976_v61, 1  ;;  %v1313_v0 = vpop.f32.mrb[7].mxu1 }
 0x8dd   : > { %v1364_v2 = vrot.slane %v1313_v0, 1  ;;  %1348 = vrot.lane.b32.xlu0 %v1313_v0, %s2513_s7  ;;  %v1336_v3 = vrot.slane %v1313_v0, 7 }
 0x8df   : > { %v1979_v4 = vpop.f32.mrb[8].mxu1  ;;  %v1366_v5 = vsel %vm655_vm2, %v1364_v2, %v1365_v63  ;;  %v1338_v6 = vsel %vm647_vm3, %v1336_v3, %v1337_v62  ;;  %v1347_v18 = vsel %vm647_vm3, 0.0, %v1336_v3 }
 0x8e0   : > { %v1341_v7 = vrot.slane %v1979_v4, 7  ;;  %v1369_v8 = vrot.slane %v1979_v4, 1  ;;  %1374 = vrot.lane.b32.xlu1 %v1366_v5, %s2512_s2  ;;  %v1323_v9 = vpop.f32.mrb[9].mxu1 }
 0x8e1   : > { %v1339_v10 = vrot.slane %v1323_v9, 7  ;;  %v1367_v11 = vrot.slane %v1323_v9, 1  ;;  %1350 = vrot.lane.b32.xlu0 %v1976_v61, %s2513_s7 }
 0x8e2   : > { %v1372_v16 = vsel %vm655_vm2, %v1369_v8, 0.0 }
 0x8e3   : > { %v1368_v12 = vsel %vm655_vm2, %v1365_v63, %v1367_v11  ;;  %v1370_v13 = vsel %vm655_vm2, %v1367_v11, %v1369_v8  ;;  %v1340_v14 = vsel %vm647_vm3, %v1337_v62, %v1339_v10  ;;  %v1342_v15 = vsel %vm647_vm3, %v1339_v10, %v1341_v7 }
 0x8e4   : > { %1376 = vrot.lane.b32.xlu1 %v1368_v12, %s2512_s2 }
 0x8e5   : > { %1352 = vrot.lane.b32.xlu0 %v1323_v9, %s2513_s7 }
 0x8e8   : > { %1378 = vrot.lane.b32.xlu1 %v1370_v13, %s2512_s2 }
 0x8e9   : > { %1354 = vrot.lane.b32.xlu0 %v1979_v4, %s2513_s7  ;;  %s3035_s7 = scalar_lea.hbm %s3133_s16, %s1874_s21 }
 0x8ec   : > { %1380 = vrot.lane.b32.xlu1 %v1372_v16, %s2512_s2  ;;  %s3132_s2 = sld [smem:[#allocation28_spill]] }
 0x8f2   : > { %v1868_v57 = vld [vmem:[%s3132_s2] ss:$0 sm:$0xff]  ;;  %s2418_s2 = scalar_lea.vmem %s2417_s11, 1024 }
 0x8f3   : > { %p2420_p3 = scmp.lt.s32.totalorder %s2418_s2, %s2412_s12 }
 0x8f5   : > { %p2421_p4 = por %p2420_p3, %p2419_p2 }
 0x8f7   : > { %p2422_p10 = pnand %p2421_p4, %p2415_p0 }
 0x94f   : > { %v1349_v17 = vpop.permute.xlu0 %1348 }
 0x950   : > { %v1360_v19 = vadd.f32 %v1349_v17, %v1347_v18 }
 0x952   : > { %v1375_v21 = vpop.permute.xlu1 %1374 }
 0x953   : > { %v1386_v22 = vadd.f32 %v1375_v21, %v1360_v19  ;;  %v1351_v23 = vpop.permute.xlu0 %1350 }
 0x954   : > { %v1361_v24 = vadd.f32 %v1351_v23, %v1338_v6 }
 0x955   : > { %v1396_v25 = vadd.f32 %v1859_v20, %v1386_v22 }
 0x956   : > { %v1377_v26 = vpop.permute.xlu1 %1376 }
 0x957   : > { %v1400_v27 = vmax.f32 %v1396_v25, 0.0  ;;  %v1387_v28 = vadd.f32 %v1377_v26, %v1361_v24  ;;  %v1353_v29 = vpop.permute.xlu0 %1352 }
 0x958   : > { %v1362_v32 = vadd.f32 %v1353_v29, %v1340_v14 }
 0x959   : > { %v1397_v33 = vadd.f32 %v1859_v20, %v1387_v28  ;;  %1860 = vmatmul.mubr.msk.f32.vlgmr.msra.gmra.mrb[8].mxu0 %vm795_vm7, %v1400_v27  ;;  %1982 = vmatprep.mubr.msk.f32.mxu1 %vm795_vm7, %v1400_v27 }
 0x95a   : > { %v1379_v34 = vpop.permute.xlu1 %1378  ;;  %1490 = vmatprep.mubr.f32.mxu0 %v2509_v1 }
 0x95b   : > { %v1401_v35 = vmax.f32 %v1397_v33, 0.0  ;;  %v1388_v36 = vadd.f32 %v1379_v34, %v1362_v32  ;;  %v1355_v37 = vpop.permute.xlu0 %1354 }
 0x95c   : > { %v1363_v38 = vadd.f32 %v1355_v37, %v1342_v15 }
 0x95d   : > { %v1398_v39 = vadd.f32 %v1859_v20, %v1388_v36  ;;  %1861 = vmatmul.mubr.msk.f32.gmra.mrb[10].mxu0 %vm795_vm7, %v1401_v35  ;;  %1983 = vmatmul.mubr.msk.f32.vlgmr.msra.gmra.mrb[10].mxu1 %vm795_vm7, %v1401_v35 }
 0x95e   : > { %v1381_v40 = vpop.permute.xlu1 %1380  ;;  %1496 = vmatprep.mubr.f32.mxu0 %v2509_v1 }
 0x95f   : > { %v1402_v41 = vmax.f32 %v1398_v39, 0.0  ;;  %v1389_v42 = vadd.f32 %v1381_v40, %v1363_v38 }
 0x961   : > { %v1399_v43 = vadd.f32 %v1859_v20, %v1389_v42  ;;  %1862 = vmatmul.mubr.msk.f32.gmra.mrb[12].mxu0 %vm795_vm7, %v1402_v41  ;;  %1985 = vmatprep.mubr.msk.f32.mxu1 %vm795_vm7, %v1402_v41 }
 0x962   : > { %1502 = vmatprep.mubr.f32.mxu0 %v2509_v1 }
 0x963   : > { %v1403_v44 = vmax.f32 %v1399_v43, 0.0 }
 0x965   : > { %1863 = vmatmul.mubr.msk.f32.gmra.mrb[14].mxu0 %vm795_vm7, %v1403_v44  ;;  %1986 = vmatmul.mubr.msk.f32.gmra.mrb[12].mxu1 %vm795_vm7, %v1403_v44 }
 0xa2c   : > { %v1486_v45 = vpop.f32.mrb[8].mxu0 }
 0xa2d   : > { %v1598_v46 = vrot.slane %v1486_v45, 7  ;;  %v1488_v47 = vpop.f32.mrb[9].mxu0 }
 0xa2f   : > { %v1609_v48 = vsel %vm647_vm3, 0.0, %v1598_v46 }
 0xa30   : > { %v1610_v49 = vadd.f32 %v1609_v48, %v1488_v47  ;;  %v1492_v50 = vpop.f32.mrb[10].mxu0  ;;  %v1984_v51 = vpop.f32.mrb[10].mxu1 }
 0xa31   : > { %v1599_v52 = vrot.slane %v1492_v50, 7  ;;  %v1619_v53 = vrot.slane %v1984_v51, 1  ;;  %v1494_v55 = vpop.f32.mrb[11].mxu0  ;;  %v1575_v30 = vpop.f32.mrb[11].mxu1 }
 0xa32   : > { %v1618_v31 = vrot.slane %v1575_v30, 1 }
 0xa33   : > { %v1600_v1 = vsel %vm647_vm3, %v1598_v46, %v1599_v52 }
 0xa34   : > { %v1611_v56 = vadd.f32 %v1600_v1, %v1494_v55  ;;  %v1620_v58 = vsel %vm655_vm2, %v1618_v31, %v1619_v53  ;;  %v1498_v54 = vpop.f32.mrb[12].mxu0 }
 0xa35   : > { %v1630_v59 = vadd.f32 %v1620_v58, %v1610_v49  ;;  %v1601_v60 = vrot.slane %v1498_v54, 7  ;;  %v1500_v61 = vpop.f32.mrb[13].mxu0 }
 0xa37   : > { %v1640_v62 = vadd.f32 %v1868_v57, %v1630_v59  ;;  %v1602_v63 = vsel %vm647_vm3, %v1599_v52, %v1601_v60 }
 0xa38   : > { %v1612_v0 = vadd.f32 %v1602_v63, %v1500_v61  ;;  %v1504_v2 = vpop.f32.mrb[14].mxu0  ;;  %v1987_v3 = vpop.f32.mrb[12].mxu1 }
 0xa39   : > { %1644 = vst [vmem:[%s563_s22] sm:$0xff] %v1640_v62  ;;  %v1603_v4 = vrot.slane %v1504_v2, 7  ;;  %v1623_v5 = vrot.slane %v1987_v3, 1  ;;  %v1506_v6 = vpop.f32.mrb[15].mxu0  ;;  %v1585_v7 = vpop.f32.mrb[13].mxu1 }
 0xa3a   : > { %v1621_v8 = vrot.slane %v1585_v7, 1 }
 0xa3b   : > { %v1604_v9 = vsel %vm647_vm3, %v1601_v60, %v1603_v4  ;;  %v1629_v13 = vsel %vm655_vm2, %v1623_v5, 0.0 }
 0xa3c   : > { %v1613_v10 = vadd.f32 %v1604_v9, %v1506_v6  ;;  %v1622_v11 = vsel %vm655_vm2, %v1619_v53, %v1621_v8  ;;  %v1624_v12 = vsel %vm655_vm2, %v1621_v8, %v1623_v5 }
 0xa3d   : > { %v1631_v14 = vadd.f32 %v1622_v11, %v1611_v56  ;;  %v1632_v15 = vadd.f32 %v1624_v12, %v1612_v0 }
 0xa3e   : > { %v1633_v16 = vadd.f32 %v1629_v13, %v1613_v10 }
 0xa3f   : > { %v1641_v17 = vadd.f32 %v1868_v57, %v1631_v14  ;;  %v1642_v18 = vadd.f32 %v1868_v57, %v1632_v15 }
 0xa40   : > { %v1643_v19 = vadd.f32 %v1868_v57, %v1633_v16 }
 0xa41   : > { %1645 = vst [vmem:[%s563_s22 + $0x8] sm:$0xff] %v1641_v17  ;;  %1646 = vst [vmem:[%s563_s22 + $0x10] sm:$0xff] %v1642_v18 }
 0xa42   : > { %1647 = vst [vmem:[%s563_s22 + $0x18] sm:$0xff] %v1643_v19 }
 0xa43   : > { %2425 = shalt.err (!%p2422_p10)
}
 0xa44   : > { %s2426_s22 = scalar_lea.hbm %s3035_s7, 512  ;;  %s2430_s13 = scalar_lea.hbm %s3133_s16, 1024 }
 0xa45   : > { %p2427_p11 = scmp.ne.s32.totalorder %s3035_s7, %s2426_s22  ;;  %p2431_p7 = scmp.lt.u32.totalorder %s3035_s7, %s3133_s16 }
 0xa46   : > { %p2432_p6 = scmp.lt.u32.totalorder %s2430_s13, %s2426_s22  ;;  %p2434_p12 = scmp.lt.u32.totalorder %s2426_s22, %s3035_s7 }
 0xa47   : > { %p2428_p8 = pnand %p2427_p11, %p3134_p1 }
 0xa48   : > { %p2433_p9 = por %p2432_p6, %p2431_p7 }
 0xa49   : > { %p2429_p5 = pneg %p2428_p8 }
 0xa4a   : > { %p2435_p13 = por %p2434_p12, %p2433_p9 }
 0xa4c   : > { %p2436_p0 = pnand %p2435_p13, %p2429_p5 }
 0xa4e   : > { %2439 = shalt.err (!%p2436_p0)
}
 0xa4f   : > { %s2515_s12 = smov 128   ;;  %s2516_s2 = smov 8  }
 0xa50   : > { %2054 = dma.vmem_to_hbm [thread:$0]  (%p3134_p1), %s3037_s1, 512, %s3035_s7, %s1649_s14, %s2515_s12, %s2515_s12, %s2516_s2  }
 0xa51 PF: > { %s1677_s21 = sand.u32 1, %s2482_s25   ;;  %p3135_p2 = scmp.ne.s32.totalorder %s3118_s30, 0 }
 0xa52   : > { %p3136_p3 = scmp.ge.s32.totalorder %s2494_s28, 2  ;;  %s1678_s22 = scalar_lea.sflag [#allocation4], %s1677_s21 }
 0xa54   : > { %p2086_p4 = pnand %p3136_p3, %p3135_p2 }
 0xa56   : > { %2477 = dma.done.wait (!%p2086_p4), %s1678_s22, 512  }
 0xa57   : > { %2479 = vsyncadd (!%p2086_p4), %s1678_s22, 4294966784  ;;  %p30_p10 = scmp.ge.s32.totalorder %s2813_s18, 4   ;;  %s3137_s25 = smov %s2486_s26 }
 0xa58   : > { %s3138_s26 = smov %s2490_s27  ;;  %s3139_s27 = smov %s2824_s29 }
 0xa59   : > { %s3140_s28 = smov %s2813_s18  ;;  %32 = sbr.rel (!%p30_p10) target bundleno = 16 (0x10), region = 149 }
 0xa60   :  { %1683 = vsyncpa [#allocation3], 1 }
 0xa61   :  { %1685 = vsyncpa [#allocation3 + $0x1], 1 }
 0xa62   :  { %1686 = vsyncpa [#allocation6], 1 }
 0xa63   :  { %1687 = vsyncpa [#allocation9], 1 }
 0xa64   :  { %1688 = vsyncpa [#allocation12], 1 }
 0xa65   :  { %1689 = vsyncpa [#allocation15], 1 }
 0xa66   :  { %1690 = vsyncpa [#allocation4], 1 }
 0xa67   :  { %1692 = vsyncpa [#allocation4 + $0x1], 1 }

</bundles_post_ra>
